<compile_context>
chip_gen: v7x
topology: tpu7x:2x2x1
jax: 0.10.0
libtpu: 0.0.40
codegen_flags: <defaults>
</compile_context>

<pallas_src>
import jax
import jax.numpy as jnp
from jax import lax
from jax.experimental import pallas as pl
from jax.experimental.pallas import tpu as pltpu


# --------------------------- Pallas conv-as-GEMM ----------------------------
def _conv_gemm_kernel(w_ref, b_ref, p_ref, o_ref):
    # w_ref: (C_out, K)  b_ref: (C_out, 1)  p_ref: (K, N)  o_ref: (C_out, N)
    acc = jnp.dot(w_ref[...], p_ref[...], preferred_element_type=jnp.float32)
    o_ref[...] = (acc + b_ref[...]).astype(o_ref.dtype)


def conv_gemm(patches, w2d, bias):
    """patches: (B, K, N); w2d: (C_out, K); bias: (C_out,) -> (B, C_out, N)."""
    B, K, N = patches.shape
    C_out = w2d.shape[0]
    return pl.pallas_call(
        _conv_gemm_kernel,
        out_shape=jax.ShapeDtypeStruct((B, C_out, N), patches.dtype),
        grid=(B,),
        in_specs=[
            pl.BlockSpec((C_out, K), lambda b: (0, 0)),      # resident weight
            pl.BlockSpec((C_out, 1), lambda b: (0, 0)),      # resident bias
            pl.BlockSpec((None, K, N), lambda b: (b, 0, 0)),  # one sample / step
        ],
        out_specs=pl.BlockSpec((None, C_out, N), lambda b: (b, 0, 0)),
        compiler_params=pltpu.CompilerParams(
            dimension_semantics=("parallel",)),
    )(w2d, bias.reshape(C_out, 1), patches)


# --------------------------- host-side layout ops ----------------------------
def _circular_pad_phi(x, p):
    if p == 0:
        return x
    return jnp.pad(x, ((0, 0), (0, 0), (0, 0), (p, p), (0, 0)), mode="wrap")


def _dilate_and_pad(x, stride, lo, hi):
    """Insert (stride-1) zeros between elements per spatial dim, then zero-pad."""
    B, C, Z, P, R = x.shape
    sz, sp, sr = stride
    out = jnp.zeros(
        (B, C, (Z - 1) * sz + 1, (P - 1) * sp + 1, (R - 1) * sr + 1), x.dtype)
    out = out.at[:, :, ::sz, ::sp, ::sr].set(x)
    pads = ((0, 0), (0, 0), (lo[0], hi[0]), (lo[1], hi[1]), (lo[2], hi[2]))
    return jnp.pad(out, pads)


def _extract_patches(x_pad, kernel, stride):
    """im2col: (B, C, Zp, Pp, Rp) -> (B, kz*kp*kr*C, Zo*Po*Ro), tap-major rows."""
    B, C, Zp, Pp, Rp = x_pad.shape
    kz, kp, kr = kernel
    sz, sp, sr = stride
    Zo = (Zp - kz) // sz + 1
    Po = (Pp - kp) // sp + 1
    Ro = (Rp - kr) // sr + 1
    taps = []
    for dz in range(kz):
        for dp in range(kp):
            for dr in range(kr):
                taps.append(
                    x_pad[:, :,
                          dz:dz + sz * (Zo - 1) + 1:sz,
                          dp:dp + sp * (Po - 1) + 1:sp,
                          dr:dr + sr * (Ro - 1) + 1:sr])
    pat = jnp.stack(taps, axis=1)                       # (B, T, C, Zo, Po, Ro)
    return pat.reshape(B, kz * kp * kr * C, Zo * Po * Ro), (Zo, Po, Ro)


def _flatten_weight(w):
    """(C_out, C_in, kz, kp, kr) -> (C_out, kz*kp*kr*C_in), matching patch rows."""
    C_out, C_in, kz, kp, kr = w.shape
    return jnp.transpose(w, (0, 2, 3, 4, 1)).reshape(C_out, kz * kp * kr * C_in)


# ----------------------------- the module ------------------------------------
class FractionalResizeLayer:
    """x -> CylindricalConvTrans(stride=numerator) -> CylindricalConv(stride=denominator).

    Weight layouts follow torch:
      w_trans: (C_in, C_out, kz, kp, kr)   [nn.ConvTranspose3d]
      w_conv : (C_out, C_in, kz, kp, kr)   [nn.Conv3d]
    `padding` must be an int (the tuple path in the torch source zeroes the
    circular pad of CylindricalConv due to an attribute-overwrite quirk).
    """

    def __init__(self, in_channels, kernel_size=(3, 4, 4), padding=1,
                 output_padding=(1, 0, 0), numerator=2, denominator=3, *,
                 w_trans, b_trans, w_conv, b_conv):
        assert isinstance(padding, int)
        if isinstance(output_padding, int):
            output_padding = (output_padding,) * 3
        self.in_channels = in_channels
        self.kernel_size = tuple(kernel_size)
        self.padding = padding
        self.output_padding = tuple(output_padding)
        self.numerator = numerator
        self.denominator = denominator
        self.w_trans, self.b_trans = w_trans, b_trans
        self.w_conv, self.b_conv = w_conv, b_conv

    def __call__(self, x):
        B, C, Z, P, R = x.shape
        n, d = self.numerator, self.denominator
        kz, kp, kr = self.kernel_size
        p = self.padding
        opz, opp, opr = self.output_padding

        # ---- stage 1: CylindricalConvTrans (circular phi pad + ConvTranspose3d)
        xp = _circular_pad_phi(x, p)          # circ pad amount = padding_orig[1] = p
        conv_pad = (p, kp - 1, p)             # padding used inside ConvTranspose3d
        lo = (kz - 1 - conv_pad[0], kp - 1 - conv_pad[1], kr - 1 - conv_pad[2])
        hi = (lo[0] + opz, lo[1] + opp, lo[2] + opr)
        xd = _dilate_and_pad(xp, (n, n, n), lo, hi)
        # equivalent forward conv weight: swap in/out channels + flip spatial taps
        w_eq = jnp.transpose(jnp.flip(self.w_trans, axis=(2, 3, 4)), (1, 0, 2, 3, 4))
        patches1, sp1 = _extract_patches(xd, (kz, kp, kr), (1, 1, 1))
        y = conv_gemm(patches1, _flatten_weight(w_eq), self.b_trans)
        y = y.reshape(B, C, *sp1)
        expected_bigger = (B, C, Z * n, P * n, R * n)
        assert y.shape == expected_bigger, (y.shape, expected_bigger)

        # ---- stage 2: CylindricalConv (circular phi pad + strided Conv3d)
        yp = _circular_pad_phi(y, p)
        yp = jnp.pad(yp, ((0, 0), (0, 0), (p, p), (0, 0), (p, p)))  # conv pad (p,0,p)
        patches2, sp2 = _extract_patches(yp, (kz, kp, kr), (d, d, d))
        out = conv_gemm(patches2, _flatten_weight(self.w_conv), self.b_conv)
        out = out.reshape(B, C, *sp2)
        # TODO(synk): the torch forward's second assert compares the output shape
        # to itself // denominator (only satisfiable when denominator == 1); we
        # assert the evidently intended contract (output == upsampled // denominator).
        expected_smaller = (B, C, (Z * n) // d, (P * n) // d, (R * n) // d)
        assert out.shape == expected_smaller, (out.shape, expected_smaller)
        return out


# --------------------------- pure-JAX reference -------------------------------
def _reference(x, w_trans, b_trans, w_conv, b_conv, *, kernel_size, padding,
               output_padding, numerator, denominator):
    kz, kp, kr = kernel_size
    p = padding
    n, d = numerator, denominator
    opz, opp, opr = output_padding
    dn = ("NCDHW", "OIDHW", "NCDHW")
    prec = lax.Precision.HIGHEST

    xp = jnp.pad(x, ((0, 0), (0, 0), (0, 0), (p, p), (0, 0)), mode="wrap")
    conv_pad = (p, kp - 1, p)
    pads = [(kz - 1 - conv_pad[0], kz - 1 - conv_pad[0] + opz),
            (kp - 1 - conv_pad[1], kp - 1 - conv_pad[1] + opp),
            (kr - 1 - conv_pad[2], kr - 1 - conv_pad[2] + opr)]
    w_eq = jnp.transpose(jnp.flip(w_trans, axis=(2, 3, 4)), (1, 0, 2, 3, 4))
    y = lax.conv_general_dilated(xp, w_eq, window_strides=(1, 1, 1), padding=pads,
                                 lhs_dilation=(n, n, n), rhs_dilation=(1, 1, 1),
                                 dimension_numbers=dn, precision=prec)
    y = y + b_trans.reshape(1, -1, 1, 1, 1)

    yp = jnp.pad(y, ((0, 0), (0, 0), (0, 0), (p, p), (0, 0)), mode="wrap")
    out = lax.conv_general_dilated(yp, w_conv, window_strides=(d, d, d),
                                   padding=[(p, p), (0, 0), (p, p)],
                                   dimension_numbers=dn, precision=prec)
    return out + b_conv.reshape(1, -1, 1, 1, 1)


if __name__ == "__main__":
    key = jax.random.PRNGKey(0)
    kx, kw1, kb1, kw2, kb2 = jax.random.split(key, 5)

    # Small shapes; spatial dims are multiples of the denominator.
    B, C, Z, P, R = 2, 4, 6, 6, 6
    kernel_size = (3, 4, 4)
    # NOTE: the module's own "output == numerator * input" contract requires
    # padding=1, output_padding=(1,0,0) for this kernel; the torch defaults
    # (padding=0, numerator=3) cannot satisfy the module's shape assertion.
    padding = 1
    output_padding = (1, 0, 0)
    numerator, denominator = 2, 3          # fractional resize by 2/3: 6 -> 4

    def bf16_exact(k, shape, scale=1.0):
        # values exactly representable in bf16 -> MXU bf16 passes stay exact
        v = scale * jax.random.normal(k, shape, dtype=jnp.float32)
        return v.astype(jnp.bfloat16).astype(jnp.float32)

    x = bf16_exact(kx, (B, C, Z, P, R))
    w_trans = bf16_exact(kw1, (C, C) + kernel_size, 0.1)   # ConvTranspose3d layout
    b_trans = bf16_exact(kb1, (C,), 0.1)
    w_conv = bf16_exact(kw2, (C, C) + kernel_size, 0.1)    # Conv3d layout
    b_conv = bf16_exact(kb2, (C,), 0.1)

    layer = FractionalResizeLayer(
        C, kernel_size=kernel_size, padding=padding, output_padding=output_padding,
        numerator=numerator, denominator=denominator,
        w_trans=w_trans, b_trans=b_trans, w_conv=w_conv, b_conv=b_conv)

    out = jax.block_until_ready(layer(x))
    ref = _reference(x, w_trans, b_trans, w_conv, b_conv,
                     kernel_size=kernel_size, padding=padding,
                     output_padding=output_padding,
                     numerator=numerator, denominator=denominator)

    expected = (B, C, Z * numerator // denominator,
                P * numerator // denominator, R * numerator // denominator)
    assert out.shape == expected, (out.shape, expected)
    max_err = float(jnp.max(jnp.abs(out - ref)))
    # tolerance covers MXU bf16-pass rounding of the (non-bf16-exact) stage-1
    # activations vs the HIGHEST-precision XLA reference.
    assert jnp.allclose(out, ref, rtol=2e-2, atol=2e-2), max_err
    print("KERNEL_OK")
</pallas_src>

<mosaic_0001>
module attributes {stable_mosaic.version = 11 : i64} {
  func.func @_conv_gemm_kernel(%arg0: i32, %arg1: memref<4x192xf32, #tpu.memory_space<vmem>>, %arg2: memref<4x1xf32, #tpu.memory_space<vmem>>, %arg3: memref<1x192x1728xf32, #tpu.memory_space<vmem>>, %arg4: memref<1x4x1728xf32, #tpu.memory_space<vmem>>) attributes {dimension_semantics = [#tpu.dimension_semantics<parallel>], iteration_bounds = array<i64: 2>, scalar_prefetch = 0 : i64, scratch_operands = 0 : i64, tpu.core_type = #tpu.core_type<tc>, window_params = [{pipeline_mode = #tpu.pipeline_mode<synchronous>, transform_indices = @transform_0, window_bounds = array<i64: 4, 192>}, {pipeline_mode = #tpu.pipeline_mode<synchronous>, transform_indices = @transform_1, window_bounds = array<i64: 4, 1>}, {transform_indices = @transform_2, window_bounds = array<i64: 1, 192, 1728>}, {transform_indices = @transform_3, window_bounds = array<i64: 1, 4, 1728>}]} {
    %c0 = arith.constant 0 : index
    %c0_0 = arith.constant 0 : index
    %0 = vector.load %arg1[%c0, %c0_0] : memref<4x192xf32, #tpu.memory_space<vmem>>, vector<4x192xf32>
    %c0_1 = arith.constant 0 : index
    %c0_2 = arith.constant 0 : index
    %c0_3 = arith.constant 0 : index
    %1 = vector.load %arg3[%c0_1, %c0_2, %c0_3] : memref<1x192x1728xf32, #tpu.memory_space<vmem>>, vector<1x192x1728xf32>
    %2 = vector.shape_cast %1 : vector<1x192x1728xf32> to vector<192x1728xf32>
    %cst = arith.constant dense<0.000000e+00> : vector<4x1728xf32>
    %3 = tpu.matmul %0, %2, %cst {dimension_numbers = #tpu.dot_dimension_numbers<[1], [0], [0], [1], [0, 0, 1, 1], [], []>} : vector<4x192xf32>, vector<192x1728xf32>, vector<4x1728xf32> -> vector<4x1728xf32>
    %c0_4 = arith.constant 0 : index
    %c0_5 = arith.constant 0 : index
    %4 = vector.load %arg2[%c0_4, %c0_5] : memref<4x1xf32, #tpu.memory_space<vmem>>, vector<4x1xf32>
    %5 = vector.broadcast %4 : vector<4x1xf32> to vector<4x1728xf32>
    %6 = arith.addf %3, %5 : vector<4x1728xf32>
    %c0_6 = arith.constant 0 : index
    %c0_7 = arith.constant 0 : index
    %c0_8 = arith.constant 0 : index
    %7 = vector.load %arg4[%c0_6, %c0_7, %c0_8] : memref<1x4x1728xf32, #tpu.memory_space<vmem>>, vector<1x4x1728xf32>
    %8 = vector.shape_cast %7 : vector<1x4x1728xf32> to vector<4x1728xf32>
    %9 = vector.shape_cast %6 : vector<4x1728xf32> to vector<1x4x1728xf32>
    tpu.vector_store %arg4[%c0_6, %c0_7, %c0_8], %9 {strides = array<i32>} : memref<1x4x1728xf32, #tpu.memory_space<vmem>>, vector<1x4x1728xf32>,
    return
  }
  func.func @transform_0(%arg0: i32) -> (i32, i32) {
    %c0_i32 = arith.constant 0 : i32
    %c0_i32_0 = arith.constant 0 : i32
    %c0_i32_1 = arith.constant 0 : i32
    return %c0_i32, %c0_i32_0 : i32, i32
  }
  func.func @transform_1(%arg0: i32) -> (i32, i32) {
    %c0_i32 = arith.constant 0 : i32
    %c0_i32_0 = arith.constant 0 : i32
    %c0_i32_1 = arith.constant 0 : i32
    return %c0_i32, %c0_i32_0 : i32, i32
  }
  func.func @transform_2(%arg0: i32) -> (i32, i32, i32) {
    %c0_i32 = arith.constant 0 : i32
    %c0_i32_0 = arith.constant 0 : i32
    %c0_i32_1 = arith.constant 0 : i32
    return %arg0, %c0_i32, %c0_i32_0 : i32, i32, i32
  }
  func.func @transform_3(%arg0: i32) -> (i32, i32, i32) {
    %c0_i32 = arith.constant 0 : i32
    %c0_i32_0 = arith.constant 0 : i32
    %c0_i32_1 = arith.constant 0 : i32
    return %arg0, %c0_i32, %c0_i32_0 : i32, i32, i32
  }
}

</mosaic_0001>

<bundles_post_ra>
// kernel: tpu_custom_call.1
= control target key start
LH: loop header
LB: loop body
LE: loop exit
PB: predicated region body
PF: predicated region fallthrough
CT: control target
= control target key end

     0   :  { %8 = vsyncpa [#allocation3], 0  ;;  %s2336_s0 = inlined_call_operand.hbm [shape: f32[4,192], index: 0, kind: input, shape index: {}]   ;;  %s2337_s1 = inlined_call_operand.vmem [shape: f32[4,1], index: 1, kind: input, shape index: {}]   ;;  %s2338_s2 = inlined_call_operand.hbm [shape: f32[2,192,1728], index: 2, kind: input, shape index: {}]   ;;  %s2339_s3 = inlined_call_operand.hbm [shape: f32[2,4,1728], index: 3, kind: output, shape index: {}]  }
   0x1   :  { %9 = vsyncpa [#allocation6], 0 }
   0x2   :  { %11 = vsyncpa [#allocation6 + $0x1], 0 }
   0x3   :  { %12 = vsyncpa [#allocation4], 0 }
   0x4   :  { %14 = vsyncpa [#allocation4 + $0x1], 0  ;;  %s1759_s12 = smov 0   ;;  %s1761_s13 = smov 0  }
   0x5   :  { %s1763_s14 = smov 0   ;;  %s1765_s15 = smov 0  }
   0x6 LB: > { %s1780_s16 = sadd.s32 4294967295, %s1731_s15   ;;  %s1182_s17 = sadd.s32 4294967294, %s1731_s15   ;;  %s1731_s15 = sphi %s1765_s15, %s2364_s15   ;;  %s1727_s14 = sphi %s1763_s14, %s2363_s14   ;;  %s1723_s13 = sphi %s1761_s13, %s2362_s13   ;;  %s1719_s12 = sphi %s1759_s12, %s2361_s12  }
   0x7   : > { %s1784_s18 = sadd.s32 1, %s1731_s15   ;;  %s69_s19 = sadd.s32 1, %s1727_s14 }
   0x8   : > { %s66_s20 = ssub.s32 %s1731_s15, %s1784_s18  ;;  %p76_p0 = scmp.ne.s32.totalorder %s1727_s14, %s1723_s13 }
   0x9   : > { %p67_p1 = scmp.eq.s32.totalorder %s66_s20, 0  ;;  %p77_p2 = scmp.eq.s32.totalorder %s1731_s15, 0 }
   0xa   : > { %p82_p3 = scmp.ne.s32.totalorder %s1723_s13, %s1719_s12  ;;  %p2340_p4 = scmp.eq.s32.totalorder %s1780_s16, 0 }
   0xb   : > { %s1796_s21 = scalar_select %p67_p1, %s1727_s14, %s69_s19  }
   0xc   : > { %p1798_p5 = por %p77_p2, %p76_p0  ;;  %p1804_p6 = por %p2340_p4, %p82_p3 }
   0xd   : > { %p106_p7 = scmp.eq.s32.totalorder %s1780_s16, 1  ;;  %p112_p8 = scmp.eq.s32.totalorder %s1182_s17, 1 }
   0xe   : > { %s2346_s23 = scalar_select %p1804_p6, 1, 0 }
   0xf   : > { %p1183_p9 = scmp.ge.s32.totalorder %s1731_s15, 1  ;;  %p119_p10 = scmp.lt.s32.totalorder %s1731_s15, 3 }
  0x10   : > { %p1811_p11 = por %p106_p7, %p76_p0  ;;  %p1815_p12 = por %p112_p8, %p82_p3 }
  0x11   : > { %p1819_p13 = pnand %p1183_p9, %p119_p10  ;;  %s1733_s27 = smov [#allocation2]  }
  0x12   : > { %s2347_s24 = scalar_select %p1811_p11, 1, 0 }
  0x13   : > { %s2348_s25 = scalar_select %p1815_p12, 1, 0 }
  0x14   : > { %s2349_s26 = scalar_select %p1819_p13, 1, 0 }
  0x15   : > { %p1548_p2 = pneg %p1819_p13  ;;  %s132_s28 = sshll.u32 %s1733_s27, 4  ;;  %s133_s28 = int_to_ptr.vmem [resolvable:$true] %s132_s28 }
  0x16   : > { %p1561_p4 = scmp.lt.s32.totalorder %s1731_s15, 2  ;;  %p2350_p0 = scmp.eq.s32.totalorder %s1780_s16, 0 }
  0x17   : > { %s146_s30 = sand.u32 1, %s1727_s14   ;;  %s1603_s8 = scalar_lea.hbm %s2336_s0, 128 }
  0x18   : > { %p1829_p7 = pnand %p1548_p2, %p2350_p0  ;;  %p1836_p3 = pnand %p1561_p4, %p1798_p5 }
  0x19   : > { %s1535_s5 = smul.u32 2688, %s146_s30  ;;  %p1604_p8 = scmp.ne.s32.totalorder %s2336_s0, %s1603_s8 }
  0x1a   : > { %s2352_s4 = scalar_select %p1836_p3, 1, 0 }
  0x1b   : > { %p1605_p9 = pneg %p1829_p7  ;;  %p1610_p4 = scmp.lt.u32.totalorder %s1603_s8, %s2336_s0 }
  0x1d   : > { %p1606_p10 = pnand %p1605_p9, %p1604_p8 }
  0x1f   : > { %p1607_p2 = pneg %p1606_p10 }
  0x21   : > { %p1612_p5 = pnand %p1610_p4, %p1607_p2 }
  0x23   : > { %1615 = shalt.err (!%p1612_p5)
}
  0x24   : > { %s1616_s19 = scalar_lea.vmem %s133_s28, 128  ;;  %p1624_p11 = scmp.lt.s32.totalorder %s133_s28, %s133_s28 }
  0x25   : > { %p1617_p0 = scmp.ne.s32.totalorder %s133_s28, %s1616_s19  ;;  %p1625_p6 = scmp.lt.s32.totalorder %s1616_s19, %s1616_s19 }
  0x27   : > { %p1619_p1 = pnand %p1617_p0, %p1605_p9  ;;  %p1626_p13 = por %p1625_p6, %p1624_p11 }
  0x29   : > { %p1620_p12 = pneg %p1619_p1 }
  0x2b   : > { %p1627_p3 = pnand %p1626_p13, %p1620_p12 }
  0x2d   : > { %1630 = shalt.err (!%p1627_p3)
}
  0x2e   : > { %1551 = dma.hbm_to_vmem [thread:$0]  (!%p1829_p7), %s2336_s0, 128, %s133_s28, [#allocation3]  }
  0x2f   : > { %s1536_s27 = smul.u32 43008, %s1731_s15  ;;  %s150_s6 = scalar_lea.vmem [#allocation5], %s1535_s5 }
  0x30   : > { %s157_s7 = sshll.u32 %s150_s6, 4  ;;  %s1864_s29 = scalar_lea.sflag [#allocation6], %s146_s30  ;;  %s1857_s7 = int_to_ptr.vmem [resolvable:$true] %s157_s7 }
  0x31   : > { %s1862_s10 = scalar_lea.hbm %s2338_s2, %s1536_s27  ;;  %p2353_p11 = scmp.ne.s32.totalorder %s2352_s4, 0 }
  0x32   : > { %s1631_s11 = scalar_lea.hbm %s1862_s10, 43008  ;;  %s1636_s17 = scalar_lea.hbm %s2338_s2, 86016 }
  0x33   : > { %p1632_p6 = scmp.ne.s32.totalorder %s1862_s10, %s1631_s11  ;;  %p1633_p12 = pneg %p2353_p11 }
  0x34   : > { %p1637_p7 = scmp.lt.u32.totalorder %s1862_s10, %s2338_s2  ;;  %p1638_p3 = scmp.lt.u32.totalorder %s1636_s17, %s1631_s11 }
  0x35   : > { %p1634_p13 = pnand %p1633_p12, %p1632_p6  ;;  %p1640_p9 = scmp.lt.u32.totalorder %s1631_s11, %s1862_s10 }
  0x36   : > { %p1639_p8 = por %p1638_p3, %p1637_p7 }
  0x37   : > { %p1635_p1 = pneg %p1634_p13 }
  0x38   : > { %p1641_p10 = por %p1640_p9, %p1639_p8 }
  0x3a   : > { %p1642_p2 = pnand %p1641_p10, %p1635_p1 }
  0x3c   : > { %1645 = shalt.err (!%p1642_p2)
}
  0x3d   : > { %s1646_s30 = scalar_lea.vmem %s1857_s7, 43008  ;;  %s1734_s22 = smov [#allocation5]  }
  0x3e   : > { %p1647_p4 = scmp.ne.s32.totalorder %s1857_s7, %s1646_s30  ;;  %s1651_s27 = sshll.u32 %s1734_s22, 4  ;;  %s1652_s27 = int_to_ptr.vmem [resolvable:$false] %s1651_s27 }
  0x3f   : > { %s1653_s6 = scalar_lea.vmem %s1652_s27, 86016  ;;  %p1654_p6 = scmp.lt.s32.totalorder %s1857_s7, %s1652_s27 }
  0x40   : > { %p1649_p5 = pnand %p1647_p4, %p1633_p12  ;;  %p1655_p13 = scmp.lt.s32.totalorder %s1653_s6, %s1646_s30 }
  0x42   : > { %p1650_p0 = pneg %p1649_p5  ;;  %p1656_p7 = por %p1655_p13, %p1654_p6 }
  0x44   : > { %p1657_p3 = pnand %p1656_p7, %p1650_p0 }
  0x46   : > { %1660 = shalt.err (!%p1657_p3)
}
  0x47   : > { %s1735_s8 = smov 1792   ;;  %s1736_s9 = smov 112  }
  0x48   : > { %1555 = dma.hbm_to_vmem [thread:$0]  (!%p2353_p11), %s1862_s10, 43008, %s1857_s7, %s1864_s29, %s1735_s8, %s1735_s8, %s1736_s9  }
  0x49   : > { %p2354_p12 = scmp.ne.s32.totalorder %s2349_s26, 0 }
  0x4a   : > { %p2355_p1 = scmp.eq.s32.totalorder (!%p2354_p12), %s1780_s16, 0 }
  0x4b   : > { %169 = sbr.rel (%p2354_p12) target bundleno = 514 (0x202), region = 32 }
  0x52   : > { %1706 = dma.done.wait (%p2355_p1), [#allocation3], 128   ;;  %p2356_p8 = pmov %p2355_p1 }
  0x53   : > { %s1899_s11 = sand.u32 1, %s1723_s13   ;;  %p2357_p11 = scmp.ne.s32.totalorder %s2346_s23, 0 }
  0x54   : > { %1708 = vsyncadd (%p2356_p8), [#allocation3], 4294967168  ;;  %s1537_s28 = smul.u32 2688, %s1899_s11  ;;  %s176_s5 = scalar_lea.sflag [#allocation6], %s1899_s11 }
  0x56   : > { %s1903_s17 = scalar_lea.vmem [#allocation5], %s1537_s28 }
  0x57   : > { %1710 = dma.done.wait (%p2357_p11), %s176_s5, 43008  }
  0x58   : > { %1712 = vsyncadd (%p2357_p11), %s176_s5, 4294924288  ;;  %v204_v0 = vld [vmem:[%s1903_s17 + $0x8] sm:$0xff]  ;;  %v218_v1 = vld [vmem:[%s1903_s17 + $0x78] sm:$0xff]  ;;  %v1737_v17 = vmov 0   ;;  %vm547_vm0 = vcmask 523264   ;;  %s1538_s4 = smul.u32 56, %s1899_s11 }
  0x59   : > { %v203_v2 = vld [vmem:[%s1903_s17] sm:$0xff]  ;;  %v1199_v3 = vpack.c.bf16 %v218_v1, %v204_v0  ;;  %v217_v4 = vld [vmem:[%s1903_s17 + $0x70] sm:$0xff]  ;;  %v232_v5 = vld [vmem:[%s1903_s17 + $0xe8] sm:$0xff]  ;;  %1600 = vset.pattern.permute.xlu0 %v1737_v17  ;;  %vm1081_vm1 = vcmask 1043456   ;;  %vm1082_vm2 = vcmask 523268   ;;  %s1539_s10 = smul.u32 896, %s1780_s16 }
  0x5a   : > { %v246_v6 = vld [vmem:[%s1903_s17 + $0x158] sm:$0xff]  ;;  %v1201_v7 = vpack.c.bf16 %v217_v4, %v203_v2  ;;  %v231_v9 = vld [vmem:[%s1903_s17 + $0xe0] sm:$0xff]  ;;  %v245_v10 = vld [vmem:[%s1903_s17 + $0x150] sm:$0xff]  ;;  %s2278_s7 = scalar_lea.vmem [#allocation7], %s1538_s4  ;;  %s1086_s22 = scalar_lea.sflag [#allocation4], %s1899_s11 }
  0x5b   : > { %v1203_v8 = vpack.c.bf16 %v246_v6, %v232_v5  ;;  %v260_v11 = vld [vmem:[%s1903_s17 + $0x1c8] sm:$0xff]  ;;  %1200 = vmatprep.subr.bf16.mxu0 %v1199_v3  ;;  %v274_v12 = vld [vmem:[%s1903_s17 + $0x238] sm:$0xff]  ;;  %v1205_v13 = vpack.c.bf16 %v245_v10, %v231_v9  ;;  %v259_v15 = vld [vmem:[%s1903_s17 + $0x1c0] sm:$0xff]  ;;  %s1100_s29 = sshll.u32 %s2278_s7, 4  ;;  %s2291_s30 = scalar_lea.hbm %s2339_s3, %s1539_s10  ;;  %s2293_s29 = int_to_ptr.vmem [resolvable:$true] %s1100_s29 }
  0x5c   : > { %1202 = vmatpush1.bf16.msra.mxu0 %v1201_v7  ;;  %v1207_v14 = vpack.c.bf16 %v274_v12, %v260_v11  ;;  %v273_v16 = vld [vmem:[%s1903_s17 + $0x230] sm:$0xff]  ;;  %v288_v18 = vld [vmem:[%s1903_s17 + $0x2a8] sm:$0xff]  ;;  %v302_v19 = vld [vmem:[%s1903_s17 + $0x318] sm:$0xff]  ;;  %s1661_s27 = scalar_lea.vmem %s2293_s29, 896  ;;  %p2358_p10 = scmp.ne.s32.totalorder %s2347_s24, 0 }
  0x5d   : > { %1204 = vmatprep.subr.bf16.mxu0 %v1203_v8  ;;  %v1209_v20 = vpack.c.bf16 %v273_v16, %v259_v15  ;;  %v1211_v21 = vpack.c.bf16 %v302_v19, %v288_v18  ;;  %v287_v22 = vld [vmem:[%s1903_s17 + $0x2a0] sm:$0xff]  ;;  %v301_v23 = vld [vmem:[%s1903_s17 + $0x310] sm:$0xff]  ;;  %v316_v24 = vld [vmem:[%s1903_s17 + $0x388] sm:$0xff]  ;;  %p1662_p9 = scmp.ne.s32.totalorder %s2293_s29, %s1661_s27  ;;  %s1738_s16 = smov [#allocation7]  }
  0x5e   : > { %v330_v25 = vld [vmem:[%s1903_s17 + $0x3f8] sm:$0xff]  ;;  %v1213_v26 = vpack.c.bf16 %v301_v23, %v287_v22  ;;  %v315_v28 = vld [vmem:[%s1903_s17 + $0x380] sm:$0xff]  ;;  %v329_v29 = vld [vmem:[%s1903_s17 + $0x3f0] sm:$0xff]  ;;  %s1665_s6 = sshll.u32 %s1738_s16, 4  ;;  %s1666_s6 = int_to_ptr.vmem [resolvable:$false] %s1665_s6 }
  0x5f   : > { %v1215_v27 = vpack.c.bf16 %v330_v25, %v316_v24  ;;  %v344_v30 = vld [vmem:[%s1903_s17 + $0x468] sm:$0xff]  ;;  %v358_v31 = vld [vmem:[%s1903_s17 + $0x4d8] sm:$0xff]  ;;  %v343_v32 = vld [vmem:[%s1903_s17 + $0x460] sm:$0xff]  ;;  %v1217_v33 = vpack.c.bf16 %v329_v29, %v315_v28  ;;  %p1663_p2 = pnand %p1662_p9, %p2358_p10  ;;  %s1667_s8 = scalar_lea.vmem %s1666_s6, 1792 }
  0x60   : > { %1206 = vmatpush1.bf16.msra.mxu0 %v1205_v13  ;;  %v1932_v34 = vld [vmem:[#allocation2] sm:$0xff]  ;;  %v220_v36 = vld [vmem:[%s1903_s17 + $0x88] sm:$0xff]  ;;  %v1219_v37 = vpack.c.bf16 %v358_v31, %v344_v30  ;;  %v357_v38 = vld [vmem:[%s1903_s17 + $0x4d0] sm:$0xff]  ;;  %p1668_p5 = scmp.lt.s32.totalorder %s2293_s29, %s1666_s6  ;;  %p1669_p0 = scmp.lt.s32.totalorder %s1667_s8, %s1661_s27 }
  0x61   : > { %1208 = vmatprep.subr.bf16.mxu0 %v1207_v14  ;;  %v206_v35 = vld [vmem:[%s1903_s17 + $0x18] sm:$0xff]  ;;  %v1939_v39 = vcombine.high %v1932_v34, %v1932_v34  ;;  %v205_v41 = vld [vmem:[%s1903_s17 + $0x10] sm:$0xff]  ;;  %v219_v42 = vld [vmem:[%s1903_s17 + $0x80] sm:$0xff]  ;;  %v1221_v49 = vpack.c.bf16 %v357_v38, %v343_v32  ;;  %p1664_p4 = pneg %p1663_p2 }
  0x62   : > { %v1247_v40 = vpack.c.bf16 %v220_v36, %v206_v35  ;;  %v372_v43 = vld [vmem:[%s1903_s17 + $0x548] sm:$0xff]  ;;  %v386_v44 = vld [vmem:[%s1903_s17 + $0x5b8] sm:$0xff]  ;;  %v1249_v45 = vpack.c.bf16 %v219_v42, %v205_v41  ;;  %v233_v48 = vld [vmem:[%s1903_s17 + $0xf0] sm:$0xff]  ;;  %p1670_p6 = por %p1669_p0, %p1668_p5 }
  0x63   : > { %1189 = vmatprep.mubr.msk.f32.mxu0 %vm547_vm0, %v1939_v39  ;;  %v234_v46 = vld [vmem:[%s1903_s17 + $0xf8] sm:$0xff]  ;;  %v248_v47 = vld [vmem:[%s1903_s17 + $0x168] sm:$0xff]  ;;  %v371_v50 = vld [vmem:[%s1903_s17 + $0x540] sm:$0xff]  ;;  %v1223_v54 = vpack.c.bf16 %v386_v44, %v372_v43  ;;  %1190 = vmatprep.mubr.msk.f32.mxu1 %vm547_vm0, %v1939_v39 }
  0x64   : > { %1210 = vmatpush1.bf16.msra.mxu0 %v1209_v20  ;;  %1248 = vmatprep.subr.bf16.mxu1 %v1247_v40  ;;  %v385_v51 = vld [vmem:[%s1903_s17 + $0x5b0] sm:$0xff]  ;;  %v1251_v52 = vpack.c.bf16 %v248_v47, %v234_v46  ;;  %v247_v53 = vld [vmem:[%s1903_s17 + $0x160] sm:$0xff]  ;;  %v400_v55 = vld [vmem:[%s1903_s17 + $0x628] sm:$0xff]  ;;  %p1671_p13 = pnand %p1670_p6, %p1664_p4 }
  0x65   : > { %1212 = vmatprep.subr.bf16.mxu0 %v1211_v21  ;;  %1250 = vmatpush1.bf16.msra.mxu1 %v1249_v45  ;;  %v414_v56 = vld [vmem:[%s1903_s17 + $0x698] sm:$0xff]  ;;  %v1253_v57 = vpack.c.bf16 %v247_v53, %v233_v48  ;;  %v276_v59 = vld [vmem:[%s1903_s17 + $0x248] sm:$0xff]  ;;  %v261_v60 = vld [vmem:[%s1903_s17 + $0x1d0] sm:$0xff]  ;;  %v1225_v63 = vpack.c.bf16 %v385_v51, %v371_v50 }
  0x66   : > { %v262_v58 = vld [vmem:[%s1903_s17 + $0x1d8] sm:$0xff]  ;;  %1252 = vmatprep.subr.bf16.mxu1 %v1251_v52  ;;  %v275_v61 = vld [vmem:[%s1903_s17 + $0x240] sm:$0xff]  ;;  %v304_v3 = vld [vmem:[%s1903_s17 + $0x328] sm:$0xff]  ;;  %v1227_v4 = vpack.c.bf16 %v414_v56, %v400_v55 }
  0x67   : > { %v1255_v62 = vpack.c.bf16 %v276_v59, %v262_v58  ;;  %v399_v0 = vld [vmem:[%s1903_s17 + $0x620] sm:$0xff]  ;;  %v1257_v1 = vpack.c.bf16 %v275_v61, %v261_v60  ;;  %v290_v2 = vld [vmem:[%s1903_s17 + $0x2b8] sm:$0xff]  ;;  %v413_v5 = vld [vmem:[%s1903_s17 + $0x690] sm:$0xff] }
  0x68   : > { %1214 = vmatpush1.bf16.msra.mxu0 %v1213_v26  ;;  %v1259_v6 = vpack.c.bf16 %v304_v3, %v290_v2  ;;  %v289_v7 = vld [vmem:[%s1903_s17 + $0x2b0] sm:$0xff]  ;;  %v303_v8 = vld [vmem:[%s1903_s17 + $0x320] sm:$0xff]  ;;  %v428_v9 = vld [vmem:[%s1903_s17 + $0x708] sm:$0xff]  ;;  %v1229_v13 = vpack.c.bf16 %v413_v5, %v399_v0 }
  0x69   : > { %1216 = vmatprep.subr.bf16.mxu0 %v1215_v27  ;;  %1254 = vmatpush1.bf16.msra.mxu1 %v1253_v57  ;;  %v442_v10 = vld [vmem:[%s1903_s17 + $0x778] sm:$0xff]  ;;  %v332_v12 = vld [vmem:[%s1903_s17 + $0x408] sm:$0xff]  ;;  %v427_v14 = vld [vmem:[%s1903_s17 + $0x700] sm:$0xff]  ;;  %v1261_v16 = vpack.c.bf16 %v303_v8, %v289_v7 }
  0x6a   : > { %1256 = vmatprep.subr.bf16.mxu1 %v1255_v62  ;;  %v318_v11 = vld [vmem:[%s1903_s17 + $0x398] sm:$0xff]  ;;  %v441_v15 = vld [vmem:[%s1903_s17 + $0x770] sm:$0xff]  ;;  %v1231_v17 = vpack.c.bf16 %v442_v10, %v428_v9  ;;  %v456_v18 = vld [vmem:[%s1903_s17 + $0x7e8] sm:$0xff] }
  0x6b   : > { %v1263_v19 = vpack.c.bf16 %v332_v12, %v318_v11  ;;  %v317_v20 = vld [vmem:[%s1903_s17 + $0x390] sm:$0xff]  ;;  %v331_v21 = vld [vmem:[%s1903_s17 + $0x400] sm:$0xff]  ;;  %v470_v22 = vld [vmem:[%s1903_s17 + $0x858] sm:$0xff]  ;;  %v1233_v25 = vpack.c.bf16 %v441_v15, %v427_v14 }
  0x6c   : > { %1218 = vmatpush1.bf16.msra.mxu0 %v1217_v33  ;;  %v346_v23 = vld [vmem:[%s1903_s17 + $0x478] sm:$0xff]  ;;  %v360_v24 = vld [vmem:[%s1903_s17 + $0x4e8] sm:$0xff]  ;;  %v455_v26 = vld [vmem:[%s1903_s17 + $0x7e0] sm:$0xff]  ;;  %v1265_v28 = vpack.c.bf16 %v331_v21, %v317_v20  ;;  %v1235_v29 = vpack.c.bf16 %v470_v22, %v456_v18 }
  0x6d   : > { %1220 = vmatprep.subr.bf16.mxu0 %v1219_v37  ;;  %1258 = vmatpush1.bf16.msra.mxu1 %v1257_v1  ;;  %v469_v27 = vld [vmem:[%s1903_s17 + $0x850] sm:$0xff]  ;;  %v484_v30 = vld [vmem:[%s1903_s17 + $0x8c8] sm:$0xff]  ;;  %v1267_v31 = vpack.c.bf16 %v360_v24, %v346_v23  ;;  %v359_v33 = vld [vmem:[%s1903_s17 + $0x4e0] sm:$0xff] }
  0x6e   : > { %1260 = vmatprep.subr.bf16.mxu1 %v1259_v6  ;;  %v345_v32 = vld [vmem:[%s1903_s17 + $0x470] sm:$0xff]  ;;  %v498_v35 = vld [vmem:[%s1903_s17 + $0x938] sm:$0xff]  ;;  %v388_v37 = vld [vmem:[%s1903_s17 + $0x5c8] sm:$0xff]  ;;  %v1237_v38 = vpack.c.bf16 %v469_v27, %v455_v26 }
  0x6f   : > { %v374_v36 = vld [vmem:[%s1903_s17 + $0x558] sm:$0xff]  ;;  %v483_v40 = vld [vmem:[%s1903_s17 + $0x8c0] sm:$0xff]  ;;  %v497_v41 = vld [vmem:[%s1903_s17 + $0x930] sm:$0xff]  ;;  %v1269_v42 = vpack.c.bf16 %v359_v33, %v345_v32  ;;  %v1239_v43 = vpack.c.bf16 %v498_v35, %v484_v30 }
  0x70   : > { %1222 = vmatpush1.bf16.msra.mxu0 %v1221_v49  ;;  %v512_v44 = vld [vmem:[%s1903_s17 + $0x9a8] sm:$0xff]  ;;  %v1271_v45 = vpack.c.bf16 %v388_v37, %v374_v36  ;;  %v373_v46 = vld [vmem:[%s1903_s17 + $0x550] sm:$0xff]  ;;  %v387_v47 = vld [vmem:[%s1903_s17 + $0x5c0] sm:$0xff]  ;;  %v1241_v51 = vpack.c.bf16 %v497_v41, %v483_v40 }
  0x71   : > { %1224 = vmatprep.subr.bf16.mxu0 %v1223_v54  ;;  %1262 = vmatpush1.bf16.msra.mxu1 %v1261_v16  ;;  %v526_v48 = vld [vmem:[%s1903_s17 + $0xa18] sm:$0xff]  ;;  %v416_v50 = vld [vmem:[%s1903_s17 + $0x6a8] sm:$0xff]  ;;  %v511_v52 = vld [vmem:[%s1903_s17 + $0x9a0] sm:$0xff]  ;;  %v1273_v54 = vpack.c.bf16 %v387_v47, %v373_v46 }
  0x72   : > { %1264 = vmatprep.subr.bf16.mxu1 %v1263_v19  ;;  %v402_v49 = vld [vmem:[%s1903_s17 + $0x638] sm:$0xff]  ;;  %v525_v53 = vld [vmem:[%s1903_s17 + $0xa10] sm:$0xff]  ;;  %v1243_v55 = vpack.c.bf16 %v526_v48, %v512_v44  ;;  %v208_v56 = vld [vmem:[%s1903_s17 + $0x28] sm:$0xff] }
  0x73   : > { %v1275_v57 = vpack.c.bf16 %v416_v50, %v402_v49  ;;  %v401_v58 = vld [vmem:[%s1903_s17 + $0x630] sm:$0xff]  ;;  %v415_v59 = vld [vmem:[%s1903_s17 + $0x6a0] sm:$0xff]  ;;  %v222_v60 = vld [vmem:[%s1903_s17 + $0x98] sm:$0xff] }
  0x74   : > { %1226 = vmatpush1.bf16.msra.mxu0 %v1225_v63  ;;  %v430_v61 = vld [vmem:[%s1903_s17 + $0x718] sm:$0xff]  ;;  %v444_v62 = vld [vmem:[%s1903_s17 + $0x788] sm:$0xff]  ;;  %v1245_v63 = vpack.c.bf16 %v525_v53, %v511_v52  ;;  %v207_v0 = vld [vmem:[%s1903_s17 + $0x20] sm:$0xff]  ;;  %v1277_v2 = vpack.c.bf16 %v415_v59, %v401_v58  ;;  %v1295_v3 = vpack.c.bf16 %v222_v60, %v208_v56 }
  0x75   : > { %1228 = vmatprep.subr.bf16.mxu0 %v1227_v4  ;;  %1266 = vmatpush1.bf16.msra.mxu1 %v1265_v28  ;;  %v221_v1 = vld [vmem:[%s1903_s17 + $0x90] sm:$0xff]  ;;  %v236_v4 = vld [vmem:[%s1903_s17 + $0x108] sm:$0xff]  ;;  %v1279_v5 = vpack.c.bf16 %v444_v62, %v430_v61  ;;  %v443_v7 = vld [vmem:[%s1903_s17 + $0x780] sm:$0xff] }
  0x76   : > { %1268 = vmatprep.subr.bf16.mxu1 %v1267_v31  ;;  %v429_v6 = vld [vmem:[%s1903_s17 + $0x710] sm:$0xff]  ;;  %v250_v8 = vld [vmem:[%s1903_s17 + $0x178] sm:$0xff]  ;;  %v472_v10 = vld [vmem:[%s1903_s17 + $0x868] sm:$0xff]  ;;  %v1297_v11 = vpack.c.bf16 %v221_v1, %v207_v0 }
  0x77   : > { %v458_v9 = vld [vmem:[%s1903_s17 + $0x7f8] sm:$0xff]  ;;  %v235_v12 = vld [vmem:[%s1903_s17 + $0x100] sm:$0xff]  ;;  %v1281_v14 = vpack.c.bf16 %v443_v7, %v429_v6  ;;  %v1299_v15 = vpack.c.bf16 %v250_v8, %v236_v4  ;;  %v264_v16 = vld [vmem:[%s1903_s17 + $0x1e8] sm:$0xff] }
  0x78   : > { %1230 = vmatpush1.bf16.msra.mxu0 %v1229_v13  ;;  %v249_v13 = vld [vmem:[%s1903_s17 + $0x170] sm:$0xff]  ;;  %v471_v19 = vld [vmem:[%s1903_s17 + $0x860] sm:$0xff]  ;;  %v278_v20 = vld [vmem:[%s1903_s17 + $0x258] sm:$0xff] }
  0x79   : > { %1232 = vmatprep.subr.bf16.mxu0 %v1231_v17  ;;  %1270 = vmatpush1.bf16.msra.mxu1 %v1269_v42  ;;  %v1283_v17 = vpack.c.bf16 %v472_v10, %v458_v9  ;;  %v457_v18 = vld [vmem:[%s1903_s17 + $0x7f0] sm:$0xff]  ;;  %v486_v21 = vld [vmem:[%s1903_s17 + $0x8d8] sm:$0xff]  ;;  %v500_v22 = vld [vmem:[%s1903_s17 + $0x948] sm:$0xff]  ;;  %v1301_v23 = vpack.c.bf16 %v249_v13, %v235_v12  ;;  %v1303_v27 = vpack.c.bf16 %v278_v20, %v264_v16 }
  0x7a   : > { %1272 = vmatprep.subr.bf16.mxu1 %v1271_v45  ;;  %v263_v24 = vld [vmem:[%s1903_s17 + $0x1e0] sm:$0xff]  ;;  %v1285_v26 = vpack.c.bf16 %v471_v19, %v457_v18  ;;  %v292_v28 = vld [vmem:[%s1903_s17 + $0x2c8] sm:$0xff]  ;;  %v485_v30 = vld [vmem:[%s1903_s17 + $0x8d0] sm:$0xff] }
  0x7b   : > { %v499_v31 = vld [vmem:[%s1903_s17 + $0x940] sm:$0xff]  ;;  %v306_v32 = vld [vmem:[%s1903_s17 + $0x338] sm:$0xff]  ;;  %v528_v35 = vld [vmem:[%s1903_s17 + $0xa28] sm:$0xff] }
  0x7c   : > { %1234 = vmatpush1.bf16.msra.mxu0 %v1233_v25  ;;  %v277_v25 = vld [vmem:[%s1903_s17 + $0x250] sm:$0xff]  ;;  %v514_v33 = vld [vmem:[%s1903_s17 + $0x9b8] sm:$0xff]  ;;  %v291_v37 = vld [vmem:[%s1903_s17 + $0x2c0] sm:$0xff]  ;;  %v1289_v40 = vpack.c.bf16 %v499_v31, %v485_v30  ;;  %v1307_v41 = vpack.c.bf16 %v306_v32, %v292_v28 }
  0x7d   : > { %1236 = vmatprep.subr.bf16.mxu0 %v1235_v29  ;;  %1274 = vmatpush1.bf16.msra.mxu1 %v1273_v54  ;;  %v1287_v29 = vpack.c.bf16 %v500_v22, %v486_v21  ;;  %v1305_v36 = vpack.c.bf16 %v277_v25, %v263_v24  ;;  %v320_v42 = vld [vmem:[%s1903_s17 + $0x3a8] sm:$0xff]  ;;  %v513_v44 = vld [vmem:[%s1903_s17 + $0x9b0] sm:$0xff]  ;;  %v527_v45 = vld [vmem:[%s1903_s17 + $0xa20] sm:$0xff] }
  0x7e   : > { %1276 = vmatprep.subr.bf16.mxu1 %v1275_v57  ;;  %v334_v46 = vld [vmem:[%s1903_s17 + $0x418] sm:$0xff]  ;;  %v224_v48 = vld [vmem:[%s1903_s17 + $0xa8] sm:$0xff]  ;;  %v319_v50 = vld [vmem:[%s1903_s17 + $0x3a0] sm:$0xff]  ;;  %v1293_v52 = vpack.c.bf16 %v527_v45, %v513_v44 }
  0x7f   : > { %v210_v47 = vld [vmem:[%s1903_s17 + $0x38] sm:$0xff]  ;;  %v1311_v53 = vpack.c.bf16 %v334_v46, %v320_v42  ;;  %v348_v54 = vld [vmem:[%s1903_s17 + $0x488] sm:$0xff]  ;;  %v209_v56 = vld [vmem:[%s1903_s17 + $0x30] sm:$0xff] }
  0x80   : > { %1238 = vmatpush1.bf16.msra.mxu0 %v1237_v38  ;;  %v305_v38 = vld [vmem:[%s1903_s17 + $0x330] sm:$0xff]  ;;  %v223_v57 = vld [vmem:[%s1903_s17 + $0xa0] sm:$0xff]  ;;  %v362_v58 = vld [vmem:[%s1903_s17 + $0x4f8] sm:$0xff] }
  0x81   : > { %1240 = vmatprep.subr.bf16.mxu0 %v1239_v43  ;;  %1278 = vmatpush1.bf16.msra.mxu1 %v1277_v2  ;;  %v1291_v43 = vpack.c.bf16 %v528_v35, %v514_v33  ;;  %v1309_v49 = vpack.c.bf16 %v305_v38, %v291_v37  ;;  %v238_v59 = vld [vmem:[%s1903_s17 + $0x118] sm:$0xff]  ;;  %v252_v60 = vld [vmem:[%s1903_s17 + $0x188] sm:$0xff]  ;;  %v347_v62 = vld [vmem:[%s1903_s17 + $0x480] sm:$0xff]  ;;  %v1345_v0 = vpack.c.bf16 %v223_v57, %v209_v56 }
  0x82   : > { %1280 = vmatprep.subr.bf16.mxu1 %v1279_v5  ;;  %v1315_v1 = vpack.c.bf16 %v362_v58, %v348_v54  ;;  %v376_v2 = vld [vmem:[%s1903_s17 + $0x568] sm:$0xff]  ;;  %v237_v4 = vld [vmem:[%s1903_s17 + $0x110] sm:$0xff]  ;;  %v251_v5 = vld [vmem:[%s1903_s17 + $0x180] sm:$0xff] }
  0x83   : > { %v390_v6 = vld [vmem:[%s1903_s17 + $0x5d8] sm:$0xff]  ;;  %v280_v8 = vld [vmem:[%s1903_s17 + $0x268] sm:$0xff]  ;;  %v375_v10 = vld [vmem:[%s1903_s17 + $0x560] sm:$0xff]  ;;  %v1349_v12 = vpack.c.bf16 %v251_v5, %v237_v4 }
  0x84   : > { %1242 = vmatpush1.bf16.msra.mxu0 %v1241_v51  ;;  %v333_v51 = vld [vmem:[%s1903_s17 + $0x410] sm:$0xff]  ;;  %v266_v7 = vld [vmem:[%s1903_s17 + $0x1f8] sm:$0xff]  ;;  %v1319_v13 = vpack.c.bf16 %v390_v6, %v376_v2  ;;  %v308_v20 = vld [vmem:[%s1903_s17 + $0x348] sm:$0xff] }
  0x85   : > { %1244 = vmatprep.subr.bf16.mxu0 %v1243_v55  ;;  %1282 = vmatpush1.bf16.msra.mxu1 %v1281_v14  ;;  %v1343_v55 = vpack.c.bf16 %v224_v48, %v210_v47  ;;  %v1313_v61 = vpack.c.bf16 %v333_v51, %v319_v50  ;;  %v404_v14 = vld [vmem:[%s1903_s17 + $0x648] sm:$0xff]  ;;  %v265_v16 = vld [vmem:[%s1903_s17 + $0x1f0] sm:$0xff]  ;;  %v418_v18 = vld [vmem:[%s1903_s17 + $0x6b8] sm:$0xff] }
  0x86   : > { %1284 = vmatprep.subr.bf16.mxu1 %v1283_v17  ;;  %v279_v17 = vld [vmem:[%s1903_s17 + $0x260] sm:$0xff]  ;;  %v294_v19 = vld [vmem:[%s1903_s17 + $0x2d8] sm:$0xff]  ;;  %v432_v24 = vld [vmem:[%s1903_s17 + $0x728] sm:$0xff] }
  0x87   : > { %v403_v22 = vld [vmem:[%s1903_s17 + $0x640] sm:$0xff]  ;;  %v1353_v25 = vpack.c.bf16 %v279_v17, %v265_v16  ;;  %v1355_v28 = vpack.c.bf16 %v308_v20, %v294_v19  ;;  %v322_v31 = vld [vmem:[%s1903_s17 + $0x3b8] sm:$0xff]  ;;  %v336_v32 = vld [vmem:[%s1903_s17 + $0x428] sm:$0xff] }
  0x88   : > { %1246 = vmatpush1.bf16.msra.mxu0 %v1245_v63  ;;  %v361_v63 = vld [vmem:[%s1903_s17 + $0x4f0] sm:$0xff]  ;;  %v307_v30 = vld [vmem:[%s1903_s17 + $0x340] sm:$0xff]  ;;  %v539_v33 = vld [vmem:[%s2337_s1] sm:$0xf]  ;;  %v1359_v42 = vpack.c.bf16 %v336_v32, %v322_v31 }
  0x89   : > { %1296 = vmatprep.subr.bf16.mxu0 %v1295_v3  ;;  %1286 = vmatpush1.bf16.msra.mxu1 %v1285_v26  ;;  %v1347_v3 = vpack.c.bf16 %v252_v60, %v238_v59  ;;  %v1317_v9 = vpack.c.bf16 %v361_v63, %v347_v62  ;;  %v1323_v26 = vpack.c.bf16 %v418_v18, %v404_v14  ;;  %v445_v37 = vld [vmem:[%s1903_s17 + $0x790] sm:$0xff]  ;;  %v335_v44 = vld [vmem:[%s1903_s17 + $0x420] sm:$0xff]  ;;  %v474_v45 = vld [vmem:[%s1903_s17 + $0x878] sm:$0xff] }
  0x8a   : > { %1288 = vmatprep.subr.bf16.mxu1 %v1287_v29  ;;  %v293_v29 = vld [vmem:[%s1903_s17 + $0x2d0] sm:$0xff]  ;;  %542 = vperm.xlu0 %1600, %v539_v33   ;;  %v350_v46 = vld [vmem:[%s1903_s17 + $0x498] sm:$0xff]  ;;  %v364_v47 = vld [vmem:[%s1903_s17 + $0x508] sm:$0xff] }
  0x8b   : > { %615 = vmatmul.mubr.f32.vlgmr.msra.gmra.mrb[0].mxu0 %v1932_v34  ;;  %v1357_v38 = vpack.c.bf16 %v307_v30, %v293_v29  ;;  %v473_v50 = vld [vmem:[%s1903_s17 + $0x870] sm:$0xff]  ;;  %v1363_v54 = vpack.c.bf16 %v364_v47, %v350_v46  ;;  %v363_v56 = vld [vmem:[%s1903_s17 + $0x500] sm:$0xff]  ;;  %v502_v57 = vld [vmem:[%s1903_s17 + $0x958] sm:$0xff] }
  0x8c   : > { %1298 = vmatpush1.bf16.msra.mxu0 %v1297_v11  ;;  %1191 = vmatprep.mubr.msk.f32.mxu0 %vm547_vm0, %v1939_v39  ;;  %v389_v11 = vld [vmem:[%s1903_s17 + $0x5d0] sm:$0xff]  ;;  %v378_v58 = vld [vmem:[%s1903_s17 + $0x578] sm:$0xff]  ;;  %v392_v59 = vld [vmem:[%s1903_s17 + $0x5e8] sm:$0xff] }
  0x8d   : > { %1300 = vmatprep.subr.bf16.mxu0 %v1299_v15  ;;  %1290 = vmatpush1.bf16.msra.mxu1 %v1289_v40  ;;  %v1351_v15 = vpack.c.bf16 %v280_v8, %v266_v7  ;;  %v1321_v21 = vpack.c.bf16 %v389_v11, %v375_v10  ;;  %v501_v62 = vld [vmem:[%s1903_s17 + $0x950] sm:$0xff]  ;;  %v1367_v2 = vpack.c.bf16 %v392_v59, %v378_v58  ;;  %v391_v4 = vld [vmem:[%s1903_s17 + $0x5e0] sm:$0xff]  ;;  %v530_v5 = vld [vmem:[%s1903_s17 + $0xa38] sm:$0xff] }
  0x8e   : > { %1292 = vmatprep.subr.bf16.mxu1 %v1291_v43  ;;  %v321_v43 = vld [vmem:[%s1903_s17 + $0x3b0] sm:$0xff]  ;;  %v406_v6 = vld [vmem:[%s1903_s17 + $0x658] sm:$0xff]  ;;  %v420_v7 = vld [vmem:[%s1903_s17 + $0x6c8] sm:$0xff] }
  0x8f   : > { %v1361_v51 = vpack.c.bf16 %v335_v44, %v321_v43  ;;  %v529_v10 = vld [vmem:[%s1903_s17 + $0xa30] sm:$0xff]  ;;  %v1371_v14 = vpack.c.bf16 %v420_v7, %v406_v6  ;;  %v419_v16 = vld [vmem:[%s1903_s17 + $0x6c0] sm:$0xff]  ;;  %v226_v17 = vld [vmem:[%s1903_s17 + $0xb8] sm:$0xff] }
  0x90   : > { %1302 = vmatpush1.bf16.msra.mxu0 %v1301_v23  ;;  %v417_v23 = vld [vmem:[%s1903_s17 + $0x6b0] sm:$0xff]  ;;  %v434_v18 = vld [vmem:[%s1903_s17 + $0x738] sm:$0xff]  ;;  %v448_v19 = vld [vmem:[%s1903_s17 + $0x7a8] sm:$0xff] }
  0x91   : > { %1304 = vmatprep.subr.bf16.mxu0 %v1303_v27  ;;  %1294 = vmatpush1.bf16.msra.mxu1 %v1293_v52  ;;  %v446_v27 = vld [vmem:[%s1903_s17 + $0x798] sm:$0xff]  ;;  %v1325_v35 = vpack.c.bf16 %v417_v23, %v403_v22  ;;  %v225_v22 = vld [vmem:[%s1903_s17 + $0xb0] sm:$0xff]  ;;  %v476_v31 = vld [vmem:[%s1903_s17 + $0x888] sm:$0xff] }
  0x92   : > { %1344 = vmatprep.subr.bf16.mxu1 %v1343_v55  ;;  %v1327_v40 = vpack.c.bf16 %v446_v27, %v432_v24  ;;  %v349_v55 = vld [vmem:[%s1903_s17 + $0x490] sm:$0xff]  ;;  %v254_v29 = vld [vmem:[%s1903_s17 + $0x198] sm:$0xff]  ;;  %v239_v33 = vld [vmem:[%s1903_s17 + $0x120] sm:$0xff] }
  0x93   : > { %v1365_v63 = vpack.c.bf16 %v363_v56, %v349_v55  ;;  %v433_v27 = vld [vmem:[%s1903_s17 + $0x730] sm:$0xff]  ;;  %v462_v30 = vld [vmem:[%s1903_s17 + $0x818] sm:$0xff]  ;;  %v267_v47 = vld [vmem:[%s1903_s17 + $0x200] sm:$0xff] }
  0x94   : > { %1306 = vmatpush1.bf16.msra.mxu0 %v1305_v36  ;;  %686 = vmatmul.mubr.f32.vlgmr.msra.gmra.mrb[0].mxu1 %v1932_v34  ;;  %v431_v36 = vld [vmem:[%s1903_s17 + $0x720] sm:$0xff]  ;;  %v282_v43 = vld [vmem:[%s1903_s17 + $0x278] sm:$0xff]  ;;  %vm1083_vm3 = vmor %vm1082_vm2, %vm1081_vm1 }
  0x95   : > { %1308 = vmatprep.subr.bf16.mxu0 %v1307_v41  ;;  %1346 = vmatpush1.bf16.msra.mxu1 %v1345_v0  ;;  %v460_v41 = vld [vmem:[%s1903_s17 + $0x808] sm:$0xff]  ;;  %v1329_v48 = vpack.c.bf16 %v445_v37, %v431_v36  ;;  %v490_v44 = vld [vmem:[%s1903_s17 + $0x8f8] sm:$0xff]  ;;  %v295_v59 = vld [vmem:[%s1903_s17 + $0x2e0] sm:$0xff] }
  0x96   : > { %1348 = vmatprep.subr.bf16.mxu1 %v1347_v3  ;;  %1192 = vmatprep.mubr.msk.f32.mxu1 %vm547_vm0, %v1939_v39  ;;  %v1331_v52 = vpack.c.bf16 %v474_v45, %v460_v41  ;;  %v377_v3 = vld [vmem:[%s1903_s17 + $0x570] sm:$0xff]  ;;  %v504_v45 = vld [vmem:[%s1903_s17 + $0x968] sm:$0xff]  ;;  %v310_v55 = vld [vmem:[%s1903_s17 + $0x358] sm:$0xff] }
  0x97   : > { %v1369_v11 = vpack.c.bf16 %v391_v4, %v377_v3  ;;  %v461_v41 = vld [vmem:[%s1903_s17 + $0x810] sm:$0xff]  ;;  %v518_v56 = vld [vmem:[%s1903_s17 + $0x9d8] sm:$0xff]  ;;  %v323_v7 = vld [vmem:[%s1903_s17 + $0x3c0] sm:$0xff] }
  0x98   : > { %1310 = vmatpush1.bf16.msra.mxu0 %v1309_v49  ;;  %v459_v49 = vld [vmem:[%s1903_s17 + $0x800] sm:$0xff]  ;;  %v338_v3 = vld [vmem:[%s1903_s17 + $0x438] sm:$0xff] }
  0x99   : > { %1312 = vmatprep.subr.bf16.mxu0 %v1311_v53  ;;  %1350 = vmatpush1.bf16.msra.mxu1 %v1349_v12  ;;  %v488_v53 = vld [vmem:[%s1903_s17 + $0x8e8] sm:$0xff]  ;;  %v1333_v60 = vpack.c.bf16 %v473_v50, %v459_v49  ;;  %v214_v4 = vld [vmem:[%s1903_s17 + $0x58] sm:$0xff] }
  0x9a   : > { %1352 = vmatprep.subr.bf16.mxu1 %v1351_v15  ;;  %v1335_v0 = vpack.c.bf16 %v502_v57, %v488_v53  ;;  %v405_v15 = vld [vmem:[%s1903_s17 + $0x650] sm:$0xff]  ;;  %v532_v57 = vld [vmem:[%s1903_s17 + $0xa48] sm:$0xff] }
  0x9b   : > { %v1373_v23 = vpack.c.bf16 %v419_v16, %v405_v15  ;;  %v489_v53 = vld [vmem:[%s1903_s17 + $0x8f0] sm:$0xff]  ;;  %v366_v15 = vld [vmem:[%s1903_s17 + $0x518] sm:$0xff] }
  0x9c   : > { %1314 = vmatpush1.bf16.msra.mxu0 %v1313_v61  ;;  %v487_v61 = vld [vmem:[%s1903_s17 + $0x8e0] sm:$0xff]  ;;  %v242_v16 = vld [vmem:[%s1903_s17 + $0x138] sm:$0xff] }
  0x9d   : > { %1316 = vmatprep.subr.bf16.mxu0 %v1315_v1  ;;  %1354 = vmatpush1.bf16.msra.mxu1 %v1353_v25  ;;  %v516_v1 = vld [vmem:[%s1903_s17 + $0x9c8] sm:$0xff]  ;;  %v1337_v8 = vpack.c.bf16 %v501_v62, %v487_v61 }
  0x9e   : > { %1356 = vmatprep.subr.bf16.mxu1 %v1355_v28  ;;  %v1339_v12 = vpack.c.bf16 %v530_v5, %v516_v1  ;;  %v240_v25 = vld [vmem:[%s1903_s17 + $0x128] sm:$0xff]  ;;  %v447_v28 = vld [vmem:[%s1903_s17 + $0x7a0] sm:$0xff]  ;;  %v517_v1 = vld [vmem:[%s1903_s17 + $0x9d0] sm:$0xff] }
  0x9f   : > { %v1377_v36 = vpack.c.bf16 %v447_v28, %v433_v27  ;;  %v1395_v37 = vpack.c.bf16 %v254_v29, %v240_v25  ;;  %v228_v5 = vld [vmem:[%s1903_s17 + $0xc8] sm:$0xff]  ;;  %v241_v25 = vld [vmem:[%s1903_s17 + $0x130] sm:$0xff]  ;;  %v394_v27 = vld [vmem:[%s1903_s17 + $0x5f8] sm:$0xff] }
  0xa0   : > { %1318 = vmatpush1.bf16.msra.mxu0 %v1317_v9  ;;  %v515_v9 = vld [vmem:[%s1903_s17 + $0x9c0] sm:$0xff]  ;;  %v270_v28 = vld [vmem:[%s1903_s17 + $0x218] sm:$0xff]  ;;  %v284_v29 = vld [vmem:[%s1903_s17 + $0x288] sm:$0xff] }
  0xa1   : > { %1320 = vmatprep.subr.bf16.mxu0 %v1319_v13  ;;  %1358 = vmatpush1.bf16.msra.mxu1 %v1357_v38  ;;  %v212_v13 = vld [vmem:[%s1903_s17 + $0x48] sm:$0xff]  ;;  %v1341_v20 = vpack.c.bf16 %v529_v10, %v515_v9 }
  0xa2   : > { %1360 = vmatprep.subr.bf16.mxu1 %v1359_v42  ;;  %v1391_v24 = vpack.c.bf16 %v226_v17, %v212_v13  ;;  %v268_v38 = vld [vmem:[%s1903_s17 + $0x208] sm:$0xff]  ;;  %v475_v42 = vld [vmem:[%s1903_s17 + $0x880] sm:$0xff]  ;;  %v213_v13 = vld [vmem:[%s1903_s17 + $0x50] sm:$0xff] }
  0xa3   : > { %v1381_v49 = vpack.c.bf16 %v475_v42, %v461_v41  ;;  %v1399_v50 = vpack.c.bf16 %v282_v43, %v268_v38  ;;  %v256_v17 = vld [vmem:[%s1903_s17 + $0x1a8] sm:$0xff]  ;;  %v269_v38 = vld [vmem:[%s1903_s17 + $0x210] sm:$0xff]  ;;  %v422_v41 = vld [vmem:[%s1903_s17 + $0x6d8] sm:$0xff] }
  0xa4   : > { %1322 = vmatpush1.bf16.msra.mxu0 %v1321_v21  ;;  %v211_v21 = vld [vmem:[%s1903_s17 + $0x40] sm:$0xff]  ;;  %v312_v42 = vld [vmem:[%s1903_s17 + $0x368] sm:$0xff] }
  0xa5   : > { %1324 = vmatprep.subr.bf16.mxu0 %v1323_v26  ;;  %1362 = vmatpush1.bf16.msra.mxu1 %v1361_v51  ;;  %v1375_v26 = vpack.c.bf16 %v448_v19, %v434_v18  ;;  %v1393_v32 = vpack.c.bf16 %v225_v22, %v211_v21  ;;  %v296_v51 = vld [vmem:[%s1903_s17 + $0x2e8] sm:$0xff]  ;;  %v351_v19 = vld [vmem:[%s1903_s17 + $0x4a0] sm:$0xff] }
  0xa6   : > { %1364 = vmatprep.subr.bf16.mxu1 %v1363_v54  ;;  %v503_v54 = vld [vmem:[%s1903_s17 + $0x960] sm:$0xff]  ;;  %v1403_v62 = vpack.c.bf16 %v310_v55, %v296_v51 }
  0xa7   : > { %v1385_v61 = vpack.c.bf16 %v503_v54, %v489_v53  ;;  %v311_v51 = vld [vmem:[%s1903_s17 + $0x360] sm:$0xff]  ;;  %v326_v53 = vld [vmem:[%s1903_s17 + $0x3d8] sm:$0xff]  ;;  %v340_v54 = vld [vmem:[%s1903_s17 + $0x448] sm:$0xff] }
  0xa8   : > { %1326 = vmatpush1.bf16.msra.mxu0 %v1325_v35  ;;  %v253_v35 = vld [vmem:[%s1903_s17 + $0x190] sm:$0xff] }
  0xa9   : > { %1328 = vmatprep.subr.bf16.mxu0 %v1327_v40  ;;  %1366 = vmatpush1.bf16.msra.mxu1 %v1365_v63  ;;  %v1379_v40 = vpack.c.bf16 %v476_v31, %v462_v30  ;;  %v1397_v46 = vpack.c.bf16 %v253_v35, %v239_v33  ;;  %v324_v63 = vld [vmem:[%s1903_s17 + $0x3c8] sm:$0xff]  ;;  %v379_v31 = vld [vmem:[%s1903_s17 + $0x580] sm:$0xff] }
  0xaa   : > { %1368 = vmatprep.subr.bf16.mxu1 %v1367_v2  ;;  %v531_v2 = vld [vmem:[%s1903_s17 + $0xa40] sm:$0xff]  ;;  %v1407_v10 = vpack.c.bf16 %v338_v3, %v324_v63 }
  0xab   : > { %v1389_v9 = vpack.c.bf16 %v531_v2, %v517_v1  ;;  %v339_v63 = vld [vmem:[%s1903_s17 + $0x440] sm:$0xff]  ;;  %v354_v1 = vld [vmem:[%s1903_s17 + $0x4b8] sm:$0xff]  ;;  %v368_v2 = vld [vmem:[%s1903_s17 + $0x528] sm:$0xff] }
  0xac   : > { %1330 = vmatpush1.bf16.msra.mxu0 %v1329_v48  ;;  %v281_v48 = vld [vmem:[%s1903_s17 + $0x270] sm:$0xff] }
  0xad   : > { %1332 = vmatprep.subr.bf16.mxu0 %v1331_v52  ;;  %1370 = vmatpush1.bf16.msra.mxu1 %v1369_v11  ;;  %v1383_v52 = vpack.c.bf16 %v504_v45, %v490_v44  ;;  %v1401_v58 = vpack.c.bf16 %v281_v48, %v267_v47  ;;  %v352_v11 = vld [vmem:[%s1903_s17 + $0x4a8] sm:$0xff]  ;;  %v407_v44 = vld [vmem:[%s1903_s17 + $0x660] sm:$0xff]  ;;  %v421_v45 = vld [vmem:[%s1903_s17 + $0x6d0] sm:$0xff] }
  0xae   : > { %1372 = vmatprep.subr.bf16.mxu1 %v1371_v14  ;;  %v227_v14 = vld [vmem:[%s1903_s17 + $0xc0] sm:$0xff]  ;;  %v1411_v22 = vpack.c.bf16 %v366_v15, %v352_v11  ;;  %v436_v48 = vld [vmem:[%s1903_s17 + $0x748] sm:$0xff]  ;;  %v1421_v55 = vpack.c.bf16 %v421_v45, %v407_v44 }
  0xaf   : > { %v1441_v21 = vpack.c.bf16 %v227_v14, %v213_v13  ;;  %v367_v11 = vld [vmem:[%s1903_s17 + $0x520] sm:$0xff]  ;;  %v382_v13 = vld [vmem:[%s1903_s17 + $0x598] sm:$0xff]  ;;  %v396_v14 = vld [vmem:[%s1903_s17 + $0x608] sm:$0xff] }
  0xb0   : > { %1334 = vmatpush1.bf16.msra.mxu0 %v1333_v60  ;;  %v309_v60 = vld [vmem:[%s1903_s17 + $0x350] sm:$0xff]  ;;  %v244_v45 = vld [vmem:[%s1903_s17 + $0x148] sm:$0xff] }
  0xb1   : > { %1336 = vmatprep.subr.bf16.mxu0 %v1335_v0  ;;  %1374 = vmatpush1.bf16.msra.mxu1 %v1373_v23  ;;  %v1387_v0 = vpack.c.bf16 %v532_v57, %v518_v56  ;;  %v1405_v6 = vpack.c.bf16 %v309_v60, %v295_v59  ;;  %v380_v23 = vld [vmem:[%s1903_s17 + $0x588] sm:$0xff]  ;;  %v435_v56 = vld [vmem:[%s1903_s17 + $0x740] sm:$0xff]  ;;  %v449_v57 = vld [vmem:[%s1903_s17 + $0x7b0] sm:$0xff] }
  0xb2   : > { %1376 = vmatprep.subr.bf16.mxu1 %v1375_v26  ;;  %v255_v26 = vld [vmem:[%s1903_s17 + $0x1a0] sm:$0xff]  ;;  %v1415_v35 = vpack.c.bf16 %v394_v27, %v380_v23  ;;  %v464_v60 = vld [vmem:[%s1903_s17 + $0x828] sm:$0xff]  ;;  %v1425_v3 = vpack.c.bf16 %v449_v57, %v435_v56 }
  0xb3   : > { %v1445_v33 = vpack.c.bf16 %v255_v26, %v241_v25  ;;  %v395_v23 = vld [vmem:[%s1903_s17 + $0x600] sm:$0xff]  ;;  %v410_v25 = vld [vmem:[%s1903_s17 + $0x678] sm:$0xff]  ;;  %v424_v26 = vld [vmem:[%s1903_s17 + $0x6e8] sm:$0xff] }
  0xb4   : > { %1338 = vmatpush1.bf16.msra.mxu0 %v1337_v8  ;;  %v337_v8 = vld [vmem:[%s1903_s17 + $0x430] sm:$0xff]  ;;  %v272_v57 = vld [vmem:[%s1903_s17 + $0x228] sm:$0xff] }
  0xb5   : > { %1340 = vmatprep.subr.bf16.mxu0 %v1339_v12  ;;  %1378 = vmatpush1.bf16.msra.mxu1 %v1377_v36  ;;  %v1439_v12 = vpack.c.bf16 %v228_v5, %v214_v4  ;;  %v1409_v18 = vpack.c.bf16 %v337_v8, %v323_v7  ;;  %v408_v36 = vld [vmem:[%s1903_s17 + $0x668] sm:$0xff]  ;;  %v463_v4 = vld [vmem:[%s1903_s17 + $0x820] sm:$0xff]  ;;  %v477_v5 = vld [vmem:[%s1903_s17 + $0x890] sm:$0xff] }
  0xb6   : > { %1380 = vmatprep.subr.bf16.mxu1 %v1379_v40  ;;  %v283_v40 = vld [vmem:[%s1903_s17 + $0x280] sm:$0xff]  ;;  %v1419_v47 = vpack.c.bf16 %v422_v41, %v408_v36  ;;  %v492_v8 = vld [vmem:[%s1903_s17 + $0x908] sm:$0xff]  ;;  %v1429_v15 = vpack.c.bf16 %v477_v5, %v463_v4 }
  0xb7   : > { %v423_v36 = vld [vmem:[%s1903_s17 + $0x6e0] sm:$0xff] }
  0xb8   : > { %1342 = vmatpush1.bf16.msra.mxu0 %v1341_v20  ;;  %v365_v20 = vld [vmem:[%s1903_s17 + $0x510] sm:$0xff] }
  0xb9   : > { %1392 = vmatprep.subr.bf16.mxu0 %v1391_v24  ;;  %1382 = vmatpush1.bf16.msra.mxu1 %v1381_v49  ;;  %v1443_v24 = vpack.c.bf16 %v256_v17, %v242_v16  ;;  %v1413_v30 = vpack.c.bf16 %v365_v20, %v351_v19  ;;  %v491_v16 = vld [vmem:[%s1903_s17 + $0x900] sm:$0xff]  ;;  %v505_v17 = vld [vmem:[%s1903_s17 + $0x970] sm:$0xff]  ;;  %v520_v20 = vld [vmem:[%s1903_s17 + $0x9e8] sm:$0xff] }
  0xba   : > { %1384 = vmatprep.subr.bf16.mxu1 %v1383_v52  ;;  %v450_v52 = vld [vmem:[%s1903_s17 + $0x7b8] sm:$0xff]  ;;  %v1433_v27 = vpack.c.bf16 %v505_v17, %v491_v16  ;;  %v313_v17 = vld [vmem:[%s1903_s17 + $0x370] sm:$0xff] }
  0xbb   : > { %757 = vmatmul.mubr.f32.vlgmr.msra.gmra.mrb[2].mxu0 %v1932_v34  ;;  %v1423_v59 = vpack.c.bf16 %v450_v52, %v436_v48  ;;  %v451_v48 = vld [vmem:[%s1903_s17 + $0x7c0] sm:$0xff] }
  0xbc   : > { %1394 = vmatpush1.bf16.msra.mxu0 %v1393_v32  ;;  %1193 = vmatprep.mubr.msk.f32.mxu0 %vm547_vm0, %v1939_v39  ;;  %v393_v32 = vld [vmem:[%s1903_s17 + $0x5f0] sm:$0xff] }
  0xbd   : > { %1396 = vmatprep.subr.bf16.mxu0 %v1395_v37  ;;  %1386 = vmatpush1.bf16.msra.mxu1 %v1385_v61  ;;  %v1447_v37 = vpack.c.bf16 %v284_v29, %v270_v28  ;;  %v1417_v43 = vpack.c.bf16 %v393_v32, %v379_v31  ;;  %v1455_v61 = vpack.c.bf16 %v340_v54, %v326_v53  ;;  %v519_v28 = vld [vmem:[%s1903_s17 + $0x9e0] sm:$0xff]  ;;  %v533_v29 = vld [vmem:[%s1903_s17 + $0xa50] sm:$0xff]  ;;  %v216_v32 = vld [vmem:[%s1903_s17 + $0x68] sm:$0xff] }
  0xbe   : > { %1388 = vmatprep.subr.bf16.mxu1 %v1387_v0  ;;  %v478_v0 = vld [vmem:[%s1903_s17 + $0x898] sm:$0xff]  ;;  %v1437_v41 = vpack.c.bf16 %v533_v29, %v519_v28  ;;  %v243_v53 = vld [vmem:[%s1903_s17 + $0x140] sm:$0xff]  ;;  %v257_v54 = vld [vmem:[%s1903_s17 + $0x1b0] sm:$0xff] }
  0xbf   : > { %v1427_v7 = vpack.c.bf16 %v478_v0, %v464_v60  ;;  %v479_v60 = vld [vmem:[%s1903_s17 + $0x8a0] sm:$0xff]  ;;  %v2226_v0 = vld [vmem:[#allocation2] sm:$0xff] }
  0xc0   : > { %1398 = vmatpush1.bf16.msra.mxu0 %v1397_v46  ;;  %v1449_v46 = vpack.c.bf16 %v283_v40, %v269_v38  ;;  %v438_v38 = vld [vmem:[%s1903_s17 + $0x758] sm:$0xff]  ;;  %v452_v40 = vld [vmem:[%s1903_s17 + $0x7c8] sm:$0xff] }
  0xc1   : > { %1400 = vmatprep.subr.bf16.mxu0 %v1399_v50  ;;  %1390 = vmatpush1.bf16.msra.mxu1 %v1389_v9  ;;  %v297_v50 = vld [vmem:[%s1903_s17 + $0x2f0] sm:$0xff]  ;;  %v1459_v9 = vpack.c.bf16 %v368_v2, %v354_v1  ;;  %v1493_v1 = vpack.c.bf16 %v257_v54, %v243_v53  ;;  %v271_v2 = vld [vmem:[%s1903_s17 + $0x220] sm:$0xff]  ;;  %v370_v28 = vld [vmem:[%s1903_s17 + $0x538] sm:$0xff] }
  0xc2   : > { %1440 = vmatprep.subr.bf16.mxu1 %v1439_v12  ;;  %v506_v12 = vld [vmem:[%s1903_s17 + $0x978] sm:$0xff] }
  0xc3   : > { %v1431_v19 = vpack.c.bf16 %v506_v12, %v492_v8  ;;  %v493_v8 = vld [vmem:[%s1903_s17 + $0x910] sm:$0xff]  ;;  %v536_v12 = vld [vmem:[%s1903_s17 + $0xa68] sm:$0xff]  ;;  %v482_v53 = vld [vmem:[%s1903_s17 + $0x8b8] sm:$0xff] }
  0xc4   : > { %1402 = vmatpush1.bf16.msra.mxu0 %v1401_v58  ;;  %828 = vmatmul.mubr.f32.vlgmr.msra.gmra.mrb[2].mxu1 %v1932_v34  ;;  %v298_v34 = vld [vmem:[%s1903_s17 + $0x2f8] sm:$0xff]  ;;  %v1453_v58 = vpack.c.bf16 %v311_v51, %v297_v50  ;;  %v480_v51 = vld [vmem:[%s1903_s17 + $0x8a8] sm:$0xff] }
  0xc5   : > { %1404 = vmatprep.subr.bf16.mxu0 %v1403_v62  ;;  %1442 = vmatpush1.bf16.msra.mxu1 %v1441_v21  ;;  %v1451_v49 = vpack.c.bf16 %v312_v42, %v298_v34  ;;  %v325_v62 = vld [vmem:[%s1903_s17 + $0x3d0] sm:$0xff]  ;;  %v1463_v21 = vpack.c.bf16 %v396_v14, %v382_v13  ;;  %v215_v34 = vld [vmem:[%s1903_s17 + $0x60] sm:$0xff]  ;;  %v466_v50 = vld [vmem:[%s1903_s17 + $0x838] sm:$0xff] }
  0xc6   : > { %1444 = vmatprep.subr.bf16.mxu1 %v1443_v24  ;;  %1194 = vmatprep.mubr.msk.f32.mxu1 %vm547_vm0, %v1939_v39  ;;  %v534_v24 = vld [vmem:[%s1903_s17 + $0xa58] sm:$0xff]  ;;  %v229_v42 = vld [vmem:[%s1903_s17 + $0xd0] sm:$0xff]  ;;  %v299_v14 = vld [vmem:[%s1903_s17 + $0x300] sm:$0xff] }
  0xc7   : > { %v1435_v31 = vpack.c.bf16 %v534_v24, %v520_v20  ;;  %v1489_v52 = vpack.c.bf16 %v229_v42, %v215_v34  ;;  %v535_v20 = vld [vmem:[%s1903_s17 + $0xa60] sm:$0xff]  ;;  %v426_v34 = vld [vmem:[%s1903_s17 + $0x6f8] sm:$0xff] }
  0xc8   : > { %1406 = vmatpush1.bf16.msra.mxu0 %v1405_v6  ;;  %v1457_v6 = vpack.c.bf16 %v339_v63, %v325_v62  ;;  %v494_v62 = vld [vmem:[%s1903_s17 + $0x918] sm:$0xff]  ;;  %v508_v63 = vld [vmem:[%s1903_s17 + $0x988] sm:$0xff] }
  0xc9   : > { %1408 = vmatprep.subr.bf16.mxu0 %v1407_v10  ;;  %1446 = vmatpush1.bf16.msra.mxu1 %v1445_v33  ;;  %v353_v10 = vld [vmem:[%s1903_s17 + $0x4b0] sm:$0xff]  ;;  %v1467_v33 = vpack.c.bf16 %v424_v26, %v410_v25  ;;  %v327_v25 = vld [vmem:[%s1903_s17 + $0x3e0] sm:$0xff] }
  0xca   : > { %1448 = vmatprep.subr.bf16.mxu1 %v1447_v37  ;;  %v230_v37 = vld [vmem:[%s1903_s17 + $0xd8] sm:$0xff]  ;;  %v341_v26 = vld [vmem:[%s1903_s17 + $0x450] sm:$0xff] }
  0xcb   : > { %v1487_v44 = vpack.c.bf16 %v230_v37, %v216_v32  ;;  %v1505_v29 = vpack.c.bf16 %v341_v26, %v327_v25  ;;  %v369_v32 = vld [vmem:[%s1903_s17 + $0x530] sm:$0xff] }
  0xcc   : > { %1410 = vmatpush1.bf16.msra.mxu0 %v1409_v18  ;;  %v1461_v18 = vpack.c.bf16 %v367_v11, %v353_v10  ;;  %v314_v10 = vld [vmem:[%s1903_s17 + $0x378] sm:$0xff] }
  0xcd   : > { %1412 = vmatprep.subr.bf16.mxu0 %v1411_v22  ;;  %1450 = vmatpush1.bf16.msra.mxu1 %v1449_v46  ;;  %v381_v22 = vld [vmem:[%s1903_s17 + $0x590] sm:$0xff]  ;;  %v1471_v46 = vpack.c.bf16 %v452_v40, %v438_v38  ;;  %v522_v11 = vld [vmem:[%s1903_s17 + $0x9f8] sm:$0xff]  ;;  %v383_v38 = vld [vmem:[%s1903_s17 + $0x5a0] sm:$0xff] }
  0xce   : > { %1452 = vmatprep.subr.bf16.mxu1 %v1451_v49  ;;  %v258_v49 = vld [vmem:[%s1903_s17 + $0x1b8] sm:$0xff]  ;;  %v397_v40 = vld [vmem:[%s1903_s17 + $0x610] sm:$0xff] }
  0xcf   : > { %v1491_v56 = vpack.c.bf16 %v258_v49, %v244_v45  ;;  %v1513_v42 = vpack.c.bf16 %v397_v40, %v383_v38  ;;  %v425_v45 = vld [vmem:[%s1903_s17 + $0x6f0] sm:$0xff] }
  0xd0   : > { %1414 = vmatpush1.bf16.msra.mxu0 %v1413_v30  ;;  %v1465_v30 = vpack.c.bf16 %v395_v23, %v381_v22  ;;  %v342_v22 = vld [vmem:[%s1903_s17 + $0x458] sm:$0xff] }
  0xd1   : > { %1416 = vmatprep.subr.bf16.mxu0 %v1415_v35  ;;  %1454 = vmatpush1.bf16.msra.mxu1 %v1453_v58  ;;  %v409_v35 = vld [vmem:[%s1903_s17 + $0x670] sm:$0xff]  ;;  %v1475_v58 = vpack.c.bf16 %v480_v51, %v466_v50  ;;  %v439_v50 = vld [vmem:[%s1903_s17 + $0x760] sm:$0xff] }
  0xd2   : > { %1456 = vmatprep.subr.bf16.mxu1 %v1455_v61  ;;  %v286_v61 = vld [vmem:[%s1903_s17 + $0x298] sm:$0xff]  ;;  %v453_v51 = vld [vmem:[%s1903_s17 + $0x7d0] sm:$0xff] }
  0xd3   : > { %v1495_v5 = vpack.c.bf16 %v286_v61, %v272_v57  ;;  %v1521_v54 = vpack.c.bf16 %v453_v51, %v439_v50  ;;  %v481_v57 = vld [vmem:[%s1903_s17 + $0x8b0] sm:$0xff] }
  0xd4   : > { %1418 = vmatpush1.bf16.msra.mxu0 %v1417_v43  ;;  %v1469_v43 = vpack.c.bf16 %v423_v36, %v409_v35  ;;  %v398_v35 = vld [vmem:[%s1903_s17 + $0x618] sm:$0xff] }
  0xd5   : > { %1420 = vmatprep.subr.bf16.mxu0 %v1419_v47  ;;  %1458 = vmatpush1.bf16.msra.mxu1 %v1457_v6  ;;  %v437_v47 = vld [vmem:[%s1903_s17 + $0x750] sm:$0xff]  ;;  %v300_v6 = vld [vmem:[%s1903_s17 + $0x308] sm:$0xff] }
  0xd6   : > { %1460 = vmatprep.subr.bf16.mxu1 %v1459_v9  ;;  %v507_v9 = vld [vmem:[%s1903_s17 + $0x980] sm:$0xff]  ;;  %v1499_v16 = vpack.c.bf16 %v314_v10, %v300_v6  ;;  %v537_v6 = vld [vmem:[%s1903_s17 + $0xa70] sm:$0xff] }
  0xd8   : > { %1422 = vmatpush1.bf16.msra.mxu0 %v1421_v55  ;;  %v1473_v55 = vpack.c.bf16 %v451_v48, %v437_v47  ;;  %v454_v47 = vld [vmem:[%s1903_s17 + $0x7d8] sm:$0xff] }
  0xd9   : > { %1424 = vmatprep.subr.bf16.mxu0 %v1423_v59  ;;  %1462 = vmatpush1.bf16.msra.mxu1 %v1461_v18  ;;  %v465_v59 = vld [vmem:[%s1903_s17 + $0x830] sm:$0xff]  ;;  %v1483_v18 = vpack.c.bf16 %v536_v12, %v522_v11 }
  0xda   : > { %1464 = vmatprep.subr.bf16.mxu1 %v1463_v21  ;;  %v1477_v4 = vpack.c.bf16 %v479_v60, %v465_v59  ;;  %v328_v21 = vld [vmem:[%s1903_s17 + $0x3e8] sm:$0xff]  ;;  %v510_v59 = vld [vmem:[%s1903_s17 + $0x998] sm:$0xff] }
  0xdb   : > { %v1503_v24 = vpack.c.bf16 %v342_v22, %v328_v21 }
  0xdc   : > { %1426 = vmatpush1.bf16.msra.mxu0 %v1425_v3  ;;  %v285_v3 = vld [vmem:[%s1903_s17 + $0x290] sm:$0xff] }
  0xdd   : > { %1428 = vmatprep.subr.bf16.mxu0 %v1427_v7  ;;  %1466 = vmatpush1.bf16.msra.mxu1 %v1465_v30  ;;  %v1479_v7 = vpack.c.bf16 %v508_v63, %v494_v62  ;;  %v1497_v13 = vpack.c.bf16 %v285_v3, %v271_v2  ;;  %v495_v62 = vld [vmem:[%s1903_s17 + $0x920] sm:$0xff]  ;;  %v509_v63 = vld [vmem:[%s1903_s17 + $0x990] sm:$0xff]  ;;  %v538_v2 = vld [vmem:[%s1903_s17 + $0xa78] sm:$0xff] }
  0xde   : > { %1468 = vmatprep.subr.bf16.mxu1 %v1467_v33  ;;  %v384_v33 = vld [vmem:[%s1903_s17 + $0x5a8] sm:$0xff]  ;;  %v1529_v3 = vpack.c.bf16 %v509_v63, %v495_v62 }
  0xdf   : > { %v1511_v37 = vpack.c.bf16 %v398_v35, %v384_v33 }
  0xe0   : > { %1430 = vmatpush1.bf16.msra.mxu0 %v1429_v15  ;;  %v1481_v15 = vpack.c.bf16 %v507_v9, %v493_v8 }
  0xe1   : > { %1432 = vmatprep.subr.bf16.mxu0 %v1431_v19  ;;  %1470 = vmatpush1.bf16.msra.mxu1 %v1469_v43  ;;  %v521_v19 = vld [vmem:[%s1903_s17 + $0x9f0] sm:$0xff] }
  0xe2   : > { %1472 = vmatprep.subr.bf16.mxu1 %v1471_v46  ;;  %v1485_v23 = vpack.c.bf16 %v535_v20, %v521_v19  ;;  %v440_v46 = vld [vmem:[%s1903_s17 + $0x768] sm:$0xff] }
  0xe3   : > { %v1519_v49 = vpack.c.bf16 %v454_v47, %v440_v46 }
  0xe4   : > { %1434 = vmatpush1.bf16.msra.mxu0 %v1433_v27  ;;  %v356_v27 = vld [vmem:[%s1903_s17 + $0x4c8] sm:$0xff] }
  0xe5   : > { %1436 = vmatprep.subr.bf16.mxu0 %v1435_v31  ;;  %1474 = vmatpush1.bf16.msra.mxu1 %v1473_v55  ;;  %v1507_v30 = vpack.c.bf16 %v370_v28, %v356_v27  ;;  %v355_v31 = vld [vmem:[%s1903_s17 + $0x4c0] sm:$0xff] }
  0xe6   : > { %1476 = vmatprep.subr.bf16.mxu1 %v1475_v58  ;;  %v1509_v36 = vpack.c.bf16 %v369_v32, %v355_v31  ;;  %v496_v58 = vld [vmem:[%s1903_s17 + $0x928] sm:$0xff] }
  0xe7   : > { %v1527_v61 = vpack.c.bf16 %v510_v59, %v496_v58 }
  0xe8   : > { %1438 = vmatpush1.bf16.msra.mxu0 %v1437_v41  ;;  %v412_v41 = vld [vmem:[%s1903_s17 + $0x688] sm:$0xff] }
  0xe9   : > { %1488 = vmatprep.subr.bf16.mxu0 %v1487_v44  ;;  %1478 = vmatpush1.bf16.msra.mxu1 %v1477_v4  ;;  %v1515_v43 = vpack.c.bf16 %v426_v34, %v412_v41  ;;  %v411_v44 = vld [vmem:[%s1903_s17 + $0x680] sm:$0xff] }
  0xea   : > { %1480 = vmatprep.subr.bf16.mxu1 %v1479_v7  ;;  %v1517_v48 = vpack.c.bf16 %v425_v45, %v411_v44 }
  0xeb   : > { %899 = vmatmul.mubr.f32.vlgmr.msra.gmra.mrb[4].mxu0 %v2226_v0 }
  0xec   : > { %1490 = vmatpush1.bf16.msra.mxu0 %v1489_v52  ;;  %1195 = vmatprep.mubr.msk.f32.mxu0 %vm547_vm0, %v1939_v39  ;;  %v1501_v39 = vpack.c.bf16 %v313_v17, %v299_v14  ;;  %v468_v52 = vld [vmem:[%s1903_s17 + $0x848] sm:$0xff] }
  0xed   : > { %1492 = vmatprep.subr.bf16.mxu0 %v1491_v56  ;;  %1482 = vmatpush1.bf16.msra.mxu1 %v1481_v15  ;;  %v1523_v55 = vpack.c.bf16 %v482_v53, %v468_v52  ;;  %v467_v56 = vld [vmem:[%s1903_s17 + $0x840] sm:$0xff] }
  0xee   : > { %1484 = vmatprep.subr.bf16.mxu1 %v1483_v18  ;;  %v1525_v60 = vpack.c.bf16 %v481_v57, %v467_v56 }
  0xf0   : > { %1494 = vmatpush1.bf16.msra.mxu0 %v1493_v1  ;;  %v524_v1 = vld [vmem:[%s1903_s17 + $0xa08] sm:$0xff] }
  0xf1   : > { %1496 = vmatprep.subr.bf16.mxu0 %v1495_v5  ;;  %1486 = vmatpush1.bf16.msra.mxu1 %v1485_v23  ;;  %v1531_v4 = vpack.c.bf16 %v538_v2, %v524_v1  ;;  %v523_v5 = vld [vmem:[%s1903_s17 + $0xa00] sm:$0xff] }
  0xf2   : > { %v1533_v7 = vpack.c.bf16 %v537_v6, %v523_v5 }
  0xf4   : > { %1498 = vmatpush1.bf16.msra.mxu0 %v1497_v13  ;;  %970 = vmatmul.mubr.f32.vlgmr.msra.gmra.mrb[4].mxu1 %v2226_v0 }
  0xf5   : > { %1500 = vmatprep.subr.bf16.mxu0 %v1499_v16 }
  0xf8   : > { %1502 = vmatpush1.bf16.msra.mxu0 %v1501_v39 }
  0xf9   : > { %1504 = vmatprep.subr.bf16.mxu0 %v1503_v24 }
  0xfc   : > { %1506 = vmatpush1.bf16.msra.mxu0 %v1505_v29 }
  0xfd   : > { %1508 = vmatprep.subr.bf16.mxu0 %v1507_v30 }
 0x100   : > { %1510 = vmatpush1.bf16.msra.mxu0 %v1509_v36 }
 0x101   : > { %1512 = vmatprep.subr.bf16.mxu0 %v1511_v37 }
 0x104   : > { %1514 = vmatpush1.bf16.msra.mxu0 %v1513_v42 }
 0x105   : > { %1516 = vmatprep.subr.bf16.mxu0 %v1515_v43 }
 0x108   : > { %1518 = vmatpush1.bf16.msra.mxu0 %v1517_v48 }
 0x109   : > { %1520 = vmatprep.subr.bf16.mxu0 %v1519_v49  ;;  %v543_v8 = vpop.permute.xlu0 %542 }
 0x10c   : > { %1522 = vmatpush1.bf16.msra.mxu0 %v1521_v54 }
 0x10d   : > { %1524 = vmatprep.subr.bf16.mxu0 %v1523_v55 }
 0x110   : > { %1526 = vmatpush1.bf16.msra.mxu0 %v1525_v60 }
 0x111   : > { %1528 = vmatprep.subr.bf16.mxu0 %v1527_v61 }
 0x114   : > { %1530 = vmatpush1.bf16.msra.mxu0 %v1529_v3 }
 0x115   : > { %1532 = vmatprep.subr.bf16.mxu0 %v1531_v4 }
 0x118   : > { %1534 = vmatpush1.bf16.msra.mxu0 %v1533_v7 }
 0x11b   : > { %1041 = vmatmul.mubr.f32.vlgmr.msra.gmra.mrb[6].mxu0 %v2226_v0 }
 0x15e   : > { %v616_v9 = vpop.f32.mrb[0].mxu0 }
 0x15f   : > { %v617_v10 = vadd.f32 %v616_v9, %v543_v8  ;;  %v618_v11 = vpop.f32.mrb[1].mxu0 }
 0x160   : > { %v619_v12 = vadd.f32 %v618_v11, %v543_v8 }
 0x162   : > { %v1061_v13 = vcombine.low %v617_v10, %v619_v12 }
 0x164   : > { %1075 = vst [vmem:[%s2278_s7] sm:$0xff] %v1061_v13 }
 0x167   : > { %v687_v14 = vpop.f32.mrb[0].mxu1 }
 0x168   : > { %v688_v15 = vadd.f32 %v687_v14, %v543_v8  ;;  %v689_v16 = vpop.f32.mrb[1].mxu1 }
 0x169   : > { %v690_v17 = vadd.f32 %v689_v16, %v543_v8 }
 0x16b   : > { %v1062_v18 = vcombine.low %v688_v15, %v690_v17 }
 0x16d   : > { %1076 = vst [vmem:[%s2278_s7 + $0x8] sm:$0xff] %v1062_v18 }
 0x18e   : > { %v758_v0 = vpop.f32.mrb[2].mxu0 }
 0x18f   : > { %v759_v19 = vadd.f32 %v758_v0, %v543_v8  ;;  %v760_v20 = vpop.f32.mrb[3].mxu0 }
 0x190   : > { %v761_v21 = vadd.f32 %v760_v20, %v543_v8 }
 0x192   : > { %v1063_v22 = vcombine.low %v759_v19, %v761_v21 }
 0x194   : > { %1077 = vst [vmem:[%s2278_s7 + $0x10] sm:$0xff] %v1063_v22 }
 0x197   : > { %v829_v39 = vpop.f32.mrb[2].mxu1 }
 0x198   : > { %v830_v23 = vadd.f32 %v829_v39, %v543_v8  ;;  %v831_v24 = vpop.f32.mrb[3].mxu1 }
 0x199   : > { %v832_v25 = vadd.f32 %v831_v24, %v543_v8 }
 0x19b   : > { %v1064_v26 = vcombine.low %v830_v23, %v832_v25 }
 0x19d   : > { %1078 = vst [vmem:[%s2278_s7 + $0x18] sm:$0xff] %v1064_v26 }
 0x1be   : > { %v900_v27 = vpop.f32.mrb[4].mxu0 }
 0x1bf   : > { %v901_v28 = vadd.f32 %v900_v27, %v543_v8  ;;  %v902_v29 = vpop.f32.mrb[5].mxu0 }
 0x1c0   : > { %v903_v30 = vadd.f32 %v902_v29, %v543_v8 }
 0x1c2   : > { %v1065_v31 = vcombine.low %v901_v28, %v903_v30 }
 0x1c4   : > { %1079 = vst [vmem:[%s2278_s7 + $0x20] sm:$0xff] %v1065_v31 }
 0x1c7   : > { %v971_v32 = vpop.f32.mrb[4].mxu1 }
 0x1c8   : > { %v972_v33 = vadd.f32 %v971_v32, %v543_v8  ;;  %v973_v35 = vpop.f32.mrb[5].mxu1 }
 0x1c9   : > { %v974_v36 = vadd.f32 %v973_v35, %v543_v8 }
 0x1cb   : > { %v1066_v37 = vcombine.low %v972_v33, %v974_v36 }
 0x1cd   : > { %1080 = vst [vmem:[%s2278_s7 + $0x28] sm:$0xff] %v1066_v37 }
 0x1ee   : > { %v1042_v38 = vpop.f32.mrb[6].mxu0 }
 0x1ef   : > { %v1043_v40 = vadd.f32 %v1042_v38, %v543_v8  ;;  %v1044_v41 = vpop.f32.mrb[7].mxu0 }
 0x1f0   : > { %v1045_v34 = vadd.f32 %v1044_v41, %v543_v8 }
 0x1f2   : > { %v1067_v42 = vcombine.low %v1043_v40, %v1045_v34 }
 0x1f4   : > { %1084 = vst.msk [vmem:[%s2278_s7 + $0x30] sm:$0xff] %vm1083_vm3, %v1067_v42 }
 0x1f5   : > { %1674 = shalt.err (!%p1671_p13)
}
 0x1f6   : > { %s1675_s9 = scalar_lea.hbm %s2291_s30, 896  ;;  %s1679_s5 = scalar_lea.hbm %s2339_s3, 1792 }
 0x1f7   : > { %p1676_p7 = scmp.ne.s32.totalorder %s2291_s30, %s1675_s9  ;;  %p1680_p1 = scmp.lt.u32.totalorder %s2291_s30, %s2339_s3 }
 0x1f8   : > { %p1681_p8 = scmp.lt.u32.totalorder %s1679_s5, %s1675_s9  ;;  %p1683_p9 = scmp.lt.u32.totalorder %s1675_s9, %s2291_s30 }
 0x1f9   : > { %p1677_p3 = pnand %p1676_p7, %p2358_p10 }
 0x1fa   : > { %p1682_p11 = por %p1681_p8, %p1680_p1 }
 0x1fb   : > { %p1678_p12 = pneg %p1677_p3 }
 0x1fc   : > { %p1684_p2 = por %p1683_p9, %p1682_p11 }
 0x1fe   : > { %p1685_p4 = pnand %p1684_p2, %p1678_p12 }
 0x200   : > { %1688 = shalt.err (!%p1685_p4)
}
 0x201   : > { %1546 = dma.vmem_to_hbm [thread:$0]  (%p2358_p10), %s2293_s29, 896, %s2291_s30, %s1086_s22  }
 0x202 PF: > { %s1112_s26 = sand.u32 1, %s1719_s12   ;;  %p2359_p5 = scmp.ne.s32.totalorder %s2348_s25, 0 }
 0x203   : > { %p2360_p0 = scmp.ge.s32.totalorder %s1731_s15, 2  ;;  %s1113_s4 = scalar_lea.sflag [#allocation4], %s1112_s26 }
 0x205   : > { %p1557_p6 = pnand %p2360_p0, %p2359_p5 }
 0x207   : > { %1714 = dma.done.wait (!%p1557_p6), %s1113_s4, 896  }
 0x208   : > { %1716 = vsyncadd (!%p1557_p6), %s1113_s4, 4294966400  ;;  %p17_p13 = scmp.ge.s32.totalorder %s1784_s18, 4   ;;  %s2361_s12 = smov %s1723_s13 }
 0x209   : > { %s2362_s13 = smov %s1727_s14  ;;  %s2363_s14 = smov %s1796_s21 }
 0x20a   : > { %s2364_s15 = smov %s1784_s18  ;;  %19 = sbr.rel (!%p17_p13) target bundleno = 6 (0x6), region = 82 }
 0x211   :  { %1118 = vsyncpa [#allocation3], 1 }
 0x212   :  { %1120 = vsyncpa [#allocation3 + $0x1], 1 }
 0x213   :  { %1121 = vsyncpa [#allocation6], 1 }
 0x214   :  { %1123 = vsyncpa [#allocation6 + $0x1], 1 }
 0x215   :  { %1124 = vsyncpa [#allocation4], 1 }
 0x216   :  { %1126 = vsyncpa [#allocation4 + $0x1], 1 }

</bundles_post_ra>
